<compile_context>
chip_gen: v7x
topology: tpu7x:2x2x1
jax: 0.10.0
libtpu: 0.0.40
codegen_flags: <defaults>
</compile_context>

<pallas_src>
import functools
import math

import jax
import jax.numpy as jnp
from jax import lax
from jax.experimental import pallas as pl
from jax.experimental.pallas import tpu as pltpu

EMB = 176  # feature dim fixed by the module (linear2/3, q/k/v out, state dim)
F32 = jnp.float32


# ---------------------------------------------------------------------------
# Fused kernel: all T timesteps (+ per-step loss in train mode) in one call
# ---------------------------------------------------------------------------
def _fused_kernel(
        state_ref,      # (T, BP, EMB) real state per step (rows zero-padded)
        sym_ref,        # (T, BP, NS)  multi-hot symptoms
        lab_ref,        # (T, BP, NH)  herb labels (zeros in eval)
        mcur_ref,       # (T, BP, 1)   1.0 on active rows of step t
        wcur_ref,       # (T, BP, 1)   mask / num_visits[t]
        wnxt_ref,       # (T, BP, 1)   next-step mask / num_visits[t+1]; 0 at last step
        symtab_ref,     # (NS, EMB)
        herbtab_ref,    # (NH, EMB)
        herbtabT_ref,   # (EMB, NH)
        wv_s_ref,       # (EMB, EMB)  v-projection, symptom half
        wv_c_ref,       # (EMB, EMB)  v-projection, state half
        bv_ref,         # (1, EMB)
        W_ref,          # (EMB, 4H)   gate columns reordered to [i|f|o|g]
        U_ref,          # (H, 4H)
        bias_ref,       # (1, 4H)
        w2_ref,         # (H, EMB)
        b2_ref,         # (1, EMB)
        w3a_ref,        # (EMB, EMB)
        w3b_ref,        # (EMB, EMB)
        w3c_ref,        # (EMB, EMB)
        b3_ref,         # (1, EMB)
        convw_ref,      # (1, EMB)    Conv1d(1,1,1) weight, broadcast to a row
        convb_ref,      # (1, EMB)
        rowsq_ref,      # (1, NS)     lambda/2 * ||symptom-table rows||^2
        adjcol_ref,     # (1, NH)     1e-5 * colsum(hh_adj)
        *out_refs,
        hidden, bp, nsteps, train):
    hs = hidden
    if train:
        loss_ref, = out_refs
    else:
        probs_ref, cos_ref = out_refs

    def step(t, carry):
        h_t, c_t, cur, l_state, l_emb, l_pre, l_reg = carry

        s_t = sym_ref[t]                                   # (BP, NS)

        # symptoms (multi-hot) @ symptom embedding table
        sym_embed = jnp.dot(s_t, symtab_ref[...], preferred_element_type=F32)

        # attention over a length-1 sequence: softmax(single logit) == 1.0, so
        # the attention output is exactly V; q/k are mathematically dead.
        # cat(sym_embed, cur) @ Wv  ==  sym_embed @ Wv[:EMB] + cur @ Wv[EMB:]
        x_t = (jnp.dot(sym_embed, wv_s_ref[...], preferred_element_type=F32)
               + jnp.dot(cur, wv_c_ref[...], preferred_element_type=F32)
               + bv_ref[...])

        # LSTM cell (gate columns reordered on host to [i|f|o|g]).
        gates = (jnp.dot(x_t, W_ref[...], preferred_element_type=F32)
                 + jnp.dot(h_t, U_ref[...], preferred_element_type=F32)
                 + bias_ref[...])
        sig = jax.nn.sigmoid(gates[:, :3 * hs])
        i_t = sig[:, 0 * hs:1 * hs]
        f_t = sig[:, 1 * hs:2 * hs]
        o_t = sig[:, 2 * hs:3 * hs]
        g_t = jnp.tanh(gates[:, 3 * hs:4 * hs])
        c_new = f_t * c_t + i_t * g_t
        h_new = o_t * jnp.tanh(c_new)

        # pre_herbs
        se2 = jnp.dot(h_new, w2_ref[...], preferred_element_type=F32) + b2_ref[...]
        scores = jnp.dot(se2, herbtabT_ref[...], preferred_element_type=F32)
        probs = jax.nn.sigmoid(scores)                     # (BP, NH)

        # pre_nextvisit_staterep_herbs (train feeds labels, eval feeds probs)
        if train:
            ground = lab_ref[t]
            herbs_in = ground
        else:
            herbs_in = probs
        h_emb = jnp.dot(herbs_in, herbtab_ref[...], preferred_element_type=F32)
        drr = h_emb * convw_ref[...] + convb_ref[...]      # Conv1d(1,1,1) == w*x + b
        state_after = (jnp.dot(se2, w3a_ref[...], preferred_element_type=F32)
                       + jnp.dot(se2 * drr, w3b_ref[...], preferred_element_type=F32)
                       + jnp.dot(drr, w3c_ref[...], preferred_element_type=F32)
                       + b3_ref[...])

        # cosine(next-visit real state, predicted state).  wnxt is all-zero at
        # the last step, so the masked state-loss sum is exactly 0 there.
        t_next = jnp.minimum(t + 1, nsteps - 1)
        nxt = state_ref[t_next]
        dot_ab = jnp.sum(nxt * state_after, axis=1, keepdims=True)
        na = jnp.sqrt(jnp.sum(nxt * nxt, axis=1, keepdims=True))
        nb = jnp.sqrt(jnp.sum(state_after * state_after, axis=1, keepdims=True))
        cosv = dot_ab / jnp.maximum(na * nb, 1e-8)         # (BP, 1)

        if train:
            mc = mcur_ref[t]                               # binary row mask
            wc = wcur_ref[t]                               # mask / mb[t]
            wn = wnxt_ref[t]                               # mask / mb[t+1] (0 at last)

            diff = ground - probs
            l_pre = l_pre + jnp.sum(
                jnp.sum(diff * diff, axis=1, keepdims=True) * wc, keepdims=True)

            # lambda/2 * sum ||row||^2 over symptom rows present (== 1, as in torch)
            present = jnp.max(jnp.where(s_t == 1.0, 1.0, 0.0),
                              axis=0, keepdims=True)
            l_emb = l_emb + jnp.sum(present * rowsq_ref[...], keepdims=True)

            # 1e-5 * sum_{i,j,k} hh[i,k]*adj[j,k] == sum_{i,k} hh[i,k]*colsum(adj)[k]
            scores_m = scores * mc                         # zero padded rows
            hh = jax.nn.sigmoid(lax.dot_general(
                scores_m, scores_m, (((0,), (0,)), ((), ())),
                preferred_element_type=F32))               # (NH, NH)
            l_reg = l_reg + jnp.sum(hh * adjcol_ref[...], keepdims=True)

            l_state = l_state + jnp.sum((0.5 + 0.5 * cosv) * wn, keepdims=True)
        else:
            probs_ref[t] = probs
            cos_ref[t] = cosv

        return (h_new, c_new, state_after, l_state, l_emb, l_pre, l_reg)

    z11 = jnp.zeros((1, 1), F32)
    carry0 = (jnp.zeros((bp, hs), F32), jnp.zeros((bp, hs), F32),
              state_ref[0], z11, z11, z11, z11)
    carry = lax.fori_loop(0, nsteps, step, carry0)

    if train:
        _, _, _, l_state, l_emb, l_pre, l_reg = carry
        l_batch = l_state + l_emb + l_pre + l_reg
        lane = lax.broadcasted_iota(jnp.int32, (8, 128), 1)
        row = lax.broadcasted_iota(jnp.int32, (8, 128), 0)
        r0 = row == 0
        loss_ref[...] = (jnp.where(r0 & (lane == 0), l_batch, 0.0)
                         + jnp.where(r0 & (lane == 1), l_state, 0.0)
                         + jnp.where(r0 & (lane == 2), l_emb, 0.0)
                         + jnp.where(r0 & (lane == 3), l_pre, 0.0)
                         + jnp.where(r0 & (lane == 4), l_reg, 0.0))


# ---------------------------------------------------------------------------
# host-side packing helpers (glue, not kernels)
# ---------------------------------------------------------------------------
def _pad_rows(block, bp):
    n = block.shape[0]
    if n == bp:
        return block
    return jnp.pad(block, ((0, bp - n), (0, 0)))


def _stack_blocks(x, num_visits, bp):
    out, start = [], 0
    for nv in num_visits:
        out.append(_pad_rows(x[start:start + nv, :], bp))
        start += nv
    return jnp.stack(out, axis=0)


def _reorder_gates(w):
    # torch layout [i|f|g|o] -> [i|f|o|g] so sigmoid covers a contiguous 3H span
    i, f, g, o = jnp.split(w, 4, axis=-1)
    return jnp.concatenate([i, f, o, g], axis=-1)


def _vmem_padded_bytes(shape, itemsize=4):
    shape = tuple(int(d) for d in shape)
    if len(shape) == 1:
        shape = (1,) + shape
    lead = 1
    for d in shape[:-2]:
        lead *= d
    sub = -(-shape[-2] // 8) * 8
    lane = -(-shape[-1] // 128) * 128
    return lead * sub * lane * itemsize


# ---------------------------------------------------------------------------
# fused pallas_call wrapper
# ---------------------------------------------------------------------------
def _run_fused(params, cfg, input_seq, symptoms, labels, all_embed, num_visits,
               hh_adj, train):
    T = len(num_visits)
    H = cfg["hidden_size"]
    NS = cfg["num_symptoms"]
    NH = cfg["num_herbs"]
    BP = max(8, -(-max(num_visits) // 8) * 8)        # padded batch (sublane tile)

    # --- one-time host prep (constant for the whole call) -------------------
    state_blocks = _stack_blocks(input_seq, num_visits, BP)     # (T, BP, EMB)
    sym_blocks = _stack_blocks(symptoms, num_visits, BP)        # (T, BP, NS)
    lab_blocks = _stack_blocks(labels, num_visits, BP)          # (T, BP, NH)

    # per-step row masks with the 1/minibatch divides folded in
    rows = jnp.arange(BP, dtype=F32)[None, :, None]             # (1, BP, 1)
    nv_cur = jnp.asarray(num_visits, F32)[:, None, None]        # (T, 1, 1)
    nv_nxt = jnp.asarray(list(num_visits[1:]) + [num_visits[-1]],
                         F32)[:, None, None]
    not_last = jnp.asarray([1.0] * (T - 1) + [0.0], F32)[:, None, None]
    mcur = (rows < nv_cur).astype(F32)                          # (T, BP, 1)
    wcur = mcur / nv_cur
    wnxt = (rows < nv_nxt).astype(F32) / nv_nxt * not_last

    sym_table = all_embed[:NS, :]
    herbs_table = all_embed[:NH, :]
    herbs_table_t = herbs_table.T                               # (EMB, NH)
    lam = cfg["tcm_l2loss_lambda"]
    rowsq_scaled = (0.5 * lam) * jnp.sum(sym_table * sym_table, axis=1)[None, :]
    herb_const = 0.5 * lam * jnp.sum(herbs_table * herbs_table)
    adjcol_scaled = 1e-5 * jnp.sum(hh_adj, axis=0)[None, :]

    wv = params["wv"]
    w3 = params["w3"]
    wv_s, wv_c = wv[:EMB, :], wv[EMB:, :]
    w3a, w3b, w3c = w3[:EMB, :], w3[EMB:2 * EMB, :], w3[2 * EMB:, :]
    W_r = _reorder_gates(params["W"])
    U_r = _reorder_gates(params["U"])
    bias_r = _reorder_gates(params["bias"])
    convw_row = jnp.full((1, EMB), params["conv_w"][0], F32)
    convb_row = jnp.full((1, EMB), params["conv_b"][0], F32)

    inputs = (state_blocks, sym_blocks, lab_blocks, mcur, wcur, wnxt,
              sym_table, herbs_table, herbs_table_t,
              wv_s, wv_c, params["bv"],
              W_r, U_r, bias_r,
              params["w2"], params["b2"],
              w3a, w3b, w3c, params["b3"],
              convw_row, convb_row,
              rowsq_scaled, adjcol_scaled)

    kernel = functools.partial(_fused_kernel, hidden=H, bp=BP, nsteps=T,
                               train=train)

    vmem_spec = pl.BlockSpec(memory_space=pltpu.MemorySpace.VMEM)
    in_specs = [vmem_spec] * len(inputs)
    if train:
        out_shape = jax.ShapeDtypeStruct((8, 128), F32)
        out_specs = vmem_spec
        out_dims = [(8, 128)]
    else:
        out_shape = (jax.ShapeDtypeStruct((T, BP, NH), F32),   # predict_probs
                     jax.ShapeDtypeStruct((T, BP, 1), F32))    # cosine (trimmed)
        out_specs = (vmem_spec, vmem_spec)
        out_dims = [(T, BP, NH), (T, BP, 1)]

    # Everything stays VMEM-resident for the whole call — budget it explicitly
    # (matters for long sequences on v7x, 64 MiB physical VMEM).
    est = sum(_vmem_padded_bytes(a.shape) for a in inputs)
    est += sum(_vmem_padded_bytes(s) for s in out_dims)
    vmem_limit = max(32 * 1024 * 1024, min(96 * 1024 * 1024, int(1.4 * est)))
    # TODO(synk): for sequences whose resident footprint would exceed ~60 MiB
    # (v7x), chunk the time axis into multiple calls carrying (h, c, state).

    outs = pl.pallas_call(
        kernel,
        out_shape=out_shape,
        in_specs=in_specs,
        out_specs=out_specs,
        compiler_params=pltpu.CompilerParams(vmem_limit_bytes=vmem_limit),
    )(*inputs)

    return outs, herb_const


# ---------------------------------------------------------------------------
# Parameters (deterministic, mirrors Prediction_State_Herbs.init_weights)
# ---------------------------------------------------------------------------
def init_params(key, input_size, hidden_size):
    stdv = 1.0 / math.sqrt(hidden_size)
    ks = iter(jax.random.split(key, 20))

    def u(shape):
        return jax.random.uniform(next(ks), shape, F32, -stdv, stdv)

    return {
        "W": u((input_size, 4 * hidden_size)),
        "U": u((hidden_size, 4 * hidden_size)),
        "bias": u((1, 4 * hidden_size)),
        # nn.Linear stores (out, in); we keep the (in, out) transpose.
        "w1": u((EMB, input_size)), "b1": u((1, input_size)),  # linear1: unused in forward
        "w2": u((hidden_size, EMB)), "b2": u((1, EMB)),
        "w3": u((3 * EMB, EMB)), "b3": u((1, EMB)),
        # q/k are mathematically dead (softmax over 1 logit == 1); kept only
        # for parameter-count parity with the module — the kernel ignores them.
        "wq": u((2 * EMB, EMB)), "bq": u((1, EMB)),
        "wk": u((2 * EMB, EMB)), "bk": u((1, EMB)),
        "wv": u((2 * EMB, EMB)), "bv": u((1, EMB)),
        # Conv1d(1,1,1): init_weights -> weight ~ U(0,1), bias = 0
        "conv_w": jax.random.uniform(next(ks), (1,), F32, 0.0, 1.0),
        "conv_b": jnp.zeros((1,), F32),
    }


# ---------------------------------------------------------------------------
# forward (train=True): returns the five time-averaged losses
# ---------------------------------------------------------------------------
def forward_train(params, cfg, input_seq, symptoms_seq, labels_herbs,
                  all_embed, num_visits, hh_adj):
    T = len(num_visits)
    loss_block, herb_const = _run_fused(
        params, cfg, input_seq, symptoms_seq, labels_herbs, all_embed,
        num_visits, hh_adj, train=True)
    avg = loss_block[0, :5] / T
    # the constant herbs-embedding L2 term is identical every step, so adding
    # it to the time-average is exact.
    batch_loss = avg[0] + herb_const
    state_loss = avg[1]
    emb_loss = avg[2] + herb_const
    preherbs_loss = avg[3]
    reg_loss = avg[4]
    return batch_loss, state_loss, emb_loss, preherbs_loss, reg_loss


# ---------------------------------------------------------------------------
# forward (train=False): returns (Predict_herbs_scores, Predict_state_scores)
# ---------------------------------------------------------------------------
def forward_eval(params, cfg, input_seq, symptoms_seq, all_embed, num_visits):
    T = len(num_visits)
    NH = cfg["num_herbs"]
    total = sum(num_visits)
    dummy_labels = jnp.zeros((total, NH), F32)       # unused (probs are internal)
    dummy_adj = jnp.zeros((NH, NH), F32)             # loss path is skipped in eval
    (probs_out, cos_out), _ = _run_fused(
        params, cfg, input_seq, symptoms_seq, dummy_labels, all_embed,
        num_visits, dummy_adj, train=False)
    predict_herbs_scores = [probs_out[t, :num_visits[t], :] for t in range(T)]
    predict_state_scores = [cos_out[t, :num_visits[t + 1], 0]
                            for t in range(T - 1)]
    return predict_herbs_scores, predict_state_scores


if __name__ == "__main__":
    key = jax.random.PRNGKey(0)
    input_size = 176          # LSTM input is the 176-d attention output
    hidden_size = 32
    num_symptoms = 40
    num_herbs = 24
    num_entities = 48         # rows of all_embed (>= num_symptoms, num_herbs)
    cfg = dict(hidden_size=hidden_size, num_symptoms=num_symptoms,
               num_herbs=num_herbs, tcm_l2loss_lambda=1e-4)
    # visits per time step (static python ints; shrinking like the reference)
    num_visits = [4, 3, 2]
    total_visits = sum(num_visits)

    kp, k1, k2, k3, k4, k5 = jax.random.split(key, 6)
    params = init_params(kp, input_size, hidden_size)
    input_seq = jax.random.normal(k1, (total_visits, EMB), F32)
    symptoms = (jax.random.uniform(k2, (total_visits, num_symptoms)) < 0.3).astype(F32)
    labels = (jax.random.uniform(k3, (total_visits, num_herbs)) < 0.3).astype(F32)
    all_embed = 0.1 * jax.random.normal(k4, (num_entities, EMB), F32)
    hh_adj = (jax.random.uniform(k5, (num_herbs, num_herbs)) < 0.2).astype(F32)

    train_out = forward_train(params, cfg, input_seq, symptoms, labels,
                              all_embed, num_visits, hh_adj)
    jax.block_until_ready(train_out)

    eval_out = forward_eval(params, cfg, input_seq, symptoms, all_embed, num_visits)
    jax.block_until_ready(eval_out)

    print("KERNEL_OK")
</pallas_src>

<mosaic_0001>
module attributes {stable_mosaic.version = 11 : i64} {
  func.func @_fused_kernel(%arg0: memref<3x8x176xf32, #tpu.memory_space<vmem>>, %arg1: memref<3x8x40xf32, #tpu.memory_space<vmem>>, %arg2: memref<3x8x24xf32, #tpu.memory_space<vmem>>, %arg3: memref<3x8x1xf32, #tpu.memory_space<vmem>>, %arg4: memref<3x8x1xf32, #tpu.memory_space<vmem>>, %arg5: memref<3x8x1xf32, #tpu.memory_space<vmem>>, %arg6: memref<40x176xf32, #tpu.memory_space<vmem>>, %arg7: memref<24x176xf32, #tpu.memory_space<vmem>>, %arg8: memref<176x24xf32, #tpu.memory_space<vmem>>, %arg9: memref<176x176xf32, #tpu.memory_space<vmem>>, %arg10: memref<176x176xf32, #tpu.memory_space<vmem>>, %arg11: memref<1x176xf32, #tpu.memory_space<vmem>>, %arg12: memref<176x128xf32, #tpu.memory_space<vmem>>, %arg13: memref<32x128xf32, #tpu.memory_space<vmem>>, %arg14: memref<1x128xf32, #tpu.memory_space<vmem>>, %arg15: memref<32x176xf32, #tpu.memory_space<vmem>>, %arg16: memref<1x176xf32, #tpu.memory_space<vmem>>, %arg17: memref<176x176xf32, #tpu.memory_space<vmem>>, %arg18: memref<176x176xf32, #tpu.memory_space<vmem>>, %arg19: memref<176x176xf32, #tpu.memory_space<vmem>>, %arg20: memref<1x176xf32, #tpu.memory_space<vmem>>, %arg21: memref<1x176xf32, #tpu.memory_space<vmem>>, %arg22: memref<1x176xf32, #tpu.memory_space<vmem>>, %arg23: memref<1x40xf32, #tpu.memory_space<vmem>>, %arg24: memref<1x24xf32, #tpu.memory_space<vmem>>, %arg25: memref<8x128xf32, #tpu.memory_space<vmem>>) attributes {dimension_semantics = [], scalar_prefetch = 0 : i64, scratch_operands = 0 : i64, tpu.core_type = #tpu.core_type<tc>} {
    %cst = arith.constant 0.000000e+00 : f32
    %0 = vector.broadcast %cst : f32 to vector<1x1xf32>
    %cst_0 = arith.constant 0.000000e+00 : f32
    %1 = vector.broadcast %cst_0 : f32 to vector<8x32xf32>
    %cst_1 = arith.constant 0.000000e+00 : f32
    %2 = vector.broadcast %cst_1 : f32 to vector<8x32xf32>
    %c0 = arith.constant 0 : index
    %c0_2 = arith.constant 0 : index
    %c0_3 = arith.constant 0 : index
    %3 = vector.load %arg0[%c0, %c0_2, %c0_3] : memref<3x8x176xf32, #tpu.memory_space<vmem>>, vector<1x8x176xf32>
    %4 = vector.shape_cast %3 : vector<1x8x176xf32> to vector<8x176xf32>
    %c0_i32 = arith.constant 0 : i32
    %c3_i32 = arith.constant 3 : i32
    %5 = arith.addi %c0_i32, %c3_i32 : i32
    %c1_i32 = arith.constant 1 : i32
    %6:7 = scf.for %arg26 = %c0_i32 to %5 step %c1_i32 iter_args(%arg27 = %1, %arg28 = %2, %arg29 = %4, %arg30 = %0, %arg31 = %0, %arg32 = %0, %arg33 = %0) -> (vector<8x32xf32>, vector<8x32xf32>, vector<8x176xf32>, vector<1x1xf32>, vector<1x1xf32>, vector<1x1xf32>, vector<1x1xf32>)  : i32 {
      %54 = arith.index_cast %arg26 : i32 to index
      %c0_16 = arith.constant 0 : index
      %c0_17 = arith.constant 0 : index
      %55 = vector.load %arg1[%54, %c0_16, %c0_17] : memref<3x8x40xf32, #tpu.memory_space<vmem>>, vector<1x8x40xf32>
      %56 = vector.shape_cast %55 : vector<1x8x40xf32> to vector<8x40xf32>
      %c0_18 = arith.constant 0 : index
      %c0_19 = arith.constant 0 : index
      %57 = vector.load %arg6[%c0_18, %c0_19] : memref<40x176xf32, #tpu.memory_space<vmem>>, vector<40x176xf32>
      %cst_20 = arith.constant dense<0.000000e+00> : vector<8x176xf32>
      %58 = tpu.matmul %56, %57, %cst_20 {dimension_numbers = #tpu.dot_dimension_numbers<[1], [0], [0], [1], [0, 0, 1, 1], [], []>} : vector<8x40xf32>, vector<40x176xf32>, vector<8x176xf32> -> vector<8x176xf32>
      %c0_21 = arith.constant 0 : index
      %c0_22 = arith.constant 0 : index
      %59 = vector.load %arg9[%c0_21, %c0_22] : memref<176x176xf32, #tpu.memory_space<vmem>>, vector<176x176xf32>
      %cst_23 = arith.constant dense<0.000000e+00> : vector<8x176xf32>
      %60 = tpu.matmul %58, %59, %cst_23 {dimension_numbers = #tpu.dot_dimension_numbers<[1], [0], [0], [1], [0, 0, 1, 1], [], []>} : vector<8x176xf32>, vector<176x176xf32>, vector<8x176xf32> -> vector<8x176xf32>
      %c0_24 = arith.constant 0 : index
      %c0_25 = arith.constant 0 : index
      %61 = vector.load %arg10[%c0_24, %c0_25] : memref<176x176xf32, #tpu.memory_space<vmem>>, vector<176x176xf32>
      %cst_26 = arith.constant dense<0.000000e+00> : vector<8x176xf32>
      %62 = tpu.matmul %arg29, %61, %cst_26 {dimension_numbers = #tpu.dot_dimension_numbers<[1], [0], [0], [1], [0, 0, 1, 1], [], []>} : vector<8x176xf32>, vector<176x176xf32>, vector<8x176xf32> -> vector<8x176xf32>
      %63 = arith.addf %60, %62 : vector<8x176xf32>
      %c0_27 = arith.constant 0 : index
      %c0_28 = arith.constant 0 : index
      %64 = vector.load %arg11[%c0_27, %c0_28] : memref<1x176xf32, #tpu.memory_space<vmem>>, vector<1x176xf32>
      %65 = vector.broadcast %64 : vector<1x176xf32> to vector<8x176xf32>
      %66 = arith.addf %63, %65 : vector<8x176xf32>
      %c0_29 = arith.constant 0 : index
      %c0_30 = arith.constant 0 : index
      %67 = vector.load %arg12[%c0_29, %c0_30] : memref<176x128xf32, #tpu.memory_space<vmem>>, vector<176x128xf32>
      %cst_31 = arith.constant dense<0.000000e+00> : vector<8x128xf32>
      %68 = tpu.matmul %66, %67, %cst_31 {dimension_numbers = #tpu.dot_dimension_numbers<[1], [0], [0], [1], [0, 0, 1, 1], [], []>} : vector<8x176xf32>, vector<176x128xf32>, vector<8x128xf32> -> vector<8x128xf32>
      %c0_32 = arith.constant 0 : index
      %c0_33 = arith.constant 0 : index
      %69 = vector.load %arg13[%c0_32, %c0_33] : memref<32x128xf32, #tpu.memory_space<vmem>>, vector<32x128xf32>
      %cst_34 = arith.constant dense<0.000000e+00> : vector<8x128xf32>
      %70 = tpu.matmul %arg27, %69, %cst_34 {dimension_numbers = #tpu.dot_dimension_numbers<[1], [0], [0], [1], [0, 0, 1, 1], [], []>} : vector<8x32xf32>, vector<32x128xf32>, vector<8x128xf32> -> vector<8x128xf32>
      %71 = arith.addf %68, %70 : vector<8x128xf32>
      %c0_35 = arith.constant 0 : index
      %c0_36 = arith.constant 0 : index
      %72 = vector.load %arg14[%c0_35, %c0_36] : memref<1x128xf32, #tpu.memory_space<vmem>>, vector<1x128xf32>
      %73 = vector.broadcast %72 : vector<1x128xf32> to vector<8x128xf32>
      %74 = arith.addf %71, %73 : vector<8x128xf32>
      %75 = vector.extract_strided_slice %74 {offsets = [0, 0], sizes = [8, 96], strides = [1, 1]} : vector<8x128xf32> to vector<8x96xf32>
      %76 = arith.negf %75 : vector<8x96xf32>
      %77 = math.exp %76 : vector<8x96xf32>
      %cst_37 = arith.constant 1.000000e+00 : f32
      %78 = vector.broadcast %cst_37 : f32 to vector<8x96xf32>
      %79 = arith.addf %78, %77 : vector<8x96xf32>
      %80 = arith.divf %78, %79 : vector<8x96xf32>
      %81 = vector.extract_strided_slice %80 {offsets = [0, 0], sizes = [8, 32], strides = [1, 1]} : vector<8x96xf32> to vector<8x32xf32>
      %82 = vector.extract_strided_slice %80 {offsets = [0, 32], sizes = [8, 32], strides = [1, 1]} : vector<8x96xf32> to vector<8x32xf32>
      %83 = vector.extract_strided_slice %80 {offsets = [0, 64], sizes = [8, 32], strides = [1, 1]} : vector<8x96xf32> to vector<8x32xf32>
      %84 = vector.extract_strided_slice %74 {offsets = [0, 96], sizes = [8, 32], strides = [1, 1]} : vector<8x128xf32> to vector<8x32xf32>
      %85 = math.tanh %84 : vector<8x32xf32>
      %86 = arith.mulf %82, %arg28 : vector<8x32xf32>
      %87 = arith.mulf %81, %85 : vector<8x32xf32>
      %88 = arith.addf %86, %87 : vector<8x32xf32>
      %89 = math.tanh %88 : vector<8x32xf32>
      %90 = arith.mulf %83, %89 : vector<8x32xf32>
      %c0_38 = arith.constant 0 : index
      %c0_39 = arith.constant 0 : index
      %91 = vector.load %arg15[%c0_38, %c0_39] : memref<32x176xf32, #tpu.memory_space<vmem>>, vector<32x176xf32>
      %cst_40 = arith.constant dense<0.000000e+00> : vector<8x176xf32>
      %92 = tpu.matmul %90, %91, %cst_40 {dimension_numbers = #tpu.dot_dimension_numbers<[1], [0], [0], [1], [0, 0, 1, 1], [], []>} : vector<8x32xf32>, vector<32x176xf32>, vector<8x176xf32> -> vector<8x176xf32>
      %c0_41 = arith.constant 0 : index
      %c0_42 = arith.constant 0 : index
      %93 = vector.load %arg16[%c0_41, %c0_42] : memref<1x176xf32, #tpu.memory_space<vmem>>, vector<1x176xf32>
      %94 = vector.broadcast %93 : vector<1x176xf32> to vector<8x176xf32>
      %95 = arith.addf %92, %94 : vector<8x176xf32>
      %c0_43 = arith.constant 0 : index
      %c0_44 = arith.constant 0 : index
      %96 = vector.load %arg8[%c0_43, %c0_44] : memref<176x24xf32, #tpu.memory_space<vmem>>, vector<176x24xf32>
      %cst_45 = arith.constant dense<0.000000e+00> : vector<8x24xf32>
      %97 = tpu.matmul %95, %96, %cst_45 {dimension_numbers = #tpu.dot_dimension_numbers<[1], [0], [0], [1], [0, 0, 1, 1], [], []>} : vector<8x176xf32>, vector<176x24xf32>, vector<8x24xf32> -> vector<8x24xf32>
      %98 = arith.negf %97 : vector<8x24xf32>
      %99 = math.exp %98 : vector<8x24xf32>
      %cst_46 = arith.constant 1.000000e+00 : f32
      %100 = vector.broadcast %cst_46 : f32 to vector<8x24xf32>
      %101 = arith.addf %100, %99 : vector<8x24xf32>
      %102 = arith.divf %100, %101 : vector<8x24xf32>
      %103 = arith.index_cast %arg26 : i32 to index
      %c0_47 = arith.constant 0 : index
      %c0_48 = arith.constant 0 : index
      %104 = vector.load %arg2[%103, %c0_47, %c0_48] : memref<3x8x24xf32, #tpu.memory_space<vmem>>, vector<1x8x24xf32>
      %105 = vector.shape_cast %104 : vector<1x8x24xf32> to vector<8x24xf32>
      %c0_49 = arith.constant 0 : index
      %c0_50 = arith.constant 0 : index
      %106 = vector.load %arg7[%c0_49, %c0_50] : memref<24x176xf32, #tpu.memory_space<vmem>>, vector<24x176xf32>
      %cst_51 = arith.constant dense<0.000000e+00> : vector<8x176xf32>
      %107 = tpu.matmul %105, %106, %cst_51 {dimension_numbers = #tpu.dot_dimension_numbers<[1], [0], [0], [1], [0, 0, 1, 1], [], []>} : vector<8x24xf32>, vector<24x176xf32>, vector<8x176xf32> -> vector<8x176xf32>
      %c0_52 = arith.constant 0 : index
      %c0_53 = arith.constant 0 : index
      %108 = vector.load %arg21[%c0_52, %c0_53] : memref<1x176xf32, #tpu.memory_space<vmem>>, vector<1x176xf32>
      %109 = vector.broadcast %108 : vector<1x176xf32> to vector<8x176xf32>
      %110 = arith.mulf %107, %109 : vector<8x176xf32>
      %c0_54 = arith.constant 0 : index
      %c0_55 = arith.constant 0 : index
      %111 = vector.load %arg22[%c0_54, %c0_55] : memref<1x176xf32, #tpu.memory_space<vmem>>, vector<1x176xf32>
      %112 = vector.broadcast %111 : vector<1x176xf32> to vector<8x176xf32>
      %113 = arith.addf %110, %112 : vector<8x176xf32>
      %c0_56 = arith.constant 0 : index
      %c0_57 = arith.constant 0 : index
      %114 = vector.load %arg17[%c0_56, %c0_57] : memref<176x176xf32, #tpu.memory_space<vmem>>, vector<176x176xf32>
      %cst_58 = arith.constant dense<0.000000e+00> : vector<8x176xf32>
      %115 = tpu.matmul %95, %114, %cst_58 {dimension_numbers = #tpu.dot_dimension_numbers<[1], [0], [0], [1], [0, 0, 1, 1], [], []>} : vector<8x176xf32>, vector<176x176xf32>, vector<8x176xf32> -> vector<8x176xf32>
      %116 = arith.mulf %95, %113 : vector<8x176xf32>
      %c0_59 = arith.constant 0 : index
      %c0_60 = arith.constant 0 : index
      %117 = vector.load %arg18[%c0_59, %c0_60] : memref<176x176xf32, #tpu.memory_space<vmem>>, vector<176x176xf32>
      %cst_61 = arith.constant dense<0.000000e+00> : vector<8x176xf32>
      %118 = tpu.matmul %116, %117, %cst_61 {dimension_numbers = #tpu.dot_dimension_numbers<[1], [0], [0], [1], [0, 0, 1, 1], [], []>} : vector<8x176xf32>, vector<176x176xf32>, vector<8x176xf32> -> vector<8x176xf32>
      %119 = arith.addf %115, %118 : vector<8x176xf32>
      %c0_62 = arith.constant 0 : index
      %c0_63 = arith.constant 0 : index
      %120 = vector.load %arg19[%c0_62, %c0_63] : memref<176x176xf32, #tpu.memory_space<vmem>>, vector<176x176xf32>
      %cst_64 = arith.constant dense<0.000000e+00> : vector<8x176xf32>
      %121 = tpu.matmul %113, %120, %cst_64 {dimension_numbers = #tpu.dot_dimension_numbers<[1], [0], [0], [1], [0, 0, 1, 1], [], []>} : vector<8x176xf32>, vector<176x176xf32>, vector<8x176xf32> -> vector<8x176xf32>
      %122 = arith.addf %119, %121 : vector<8x176xf32>
      %c0_65 = arith.constant 0 : index
      %c0_66 = arith.constant 0 : index
      %123 = vector.load %arg20[%c0_65, %c0_66] : memref<1x176xf32, #tpu.memory_space<vmem>>, vector<1x176xf32>
      %124 = vector.broadcast %123 : vector<1x176xf32> to vector<8x176xf32>
      %125 = arith.addf %122, %124 : vector<8x176xf32>
      %c1_i32_67 = arith.constant 1 : i32
      %126 = arith.addi %arg26, %c1_i32_67 : i32
      %c2_i32_68 = arith.constant 2 : i32
      %127 = arith.minsi %126, %c2_i32_68 : i32
      %128 = arith.index_cast %127 : i32 to index
      %c0_69 = arith.constant 0 : index
      %c0_70 = arith.constant 0 : index
      %129 = vector.load %arg0[%128, %c0_69, %c0_70] : memref<3x8x176xf32, #tpu.memory_space<vmem>>, vector<1x8x176xf32>
      %130 = vector.shape_cast %129 : vector<1x8x176xf32> to vector<8x176xf32>
      %131 = arith.mulf %130, %125 : vector<8x176xf32>
      %cst_71 = arith.constant dense<0.000000e+00> : vector<8xf32>
      %132 = vector.multi_reduction <add>, %131, %cst_71 [1] : vector<8x176xf32> to vector<8xf32>
      %133 = vector.shape_cast %132 : vector<8xf32> to vector<8x1xf32>
      %134 = arith.mulf %130, %130 : vector<8x176xf32>
      %cst_72 = arith.constant dense<0.000000e+00> : vector<8xf32>
      %135 = vector.multi_reduction <add>, %134, %cst_72 [1] : vector<8x176xf32> to vector<8xf32>
      %136 = vector.shape_cast %135 : vector<8xf32> to vector<8x1xf32>
      %137 = math.sqrt %136 : vector<8x1xf32>
      %138 = arith.mulf %125, %125 : vector<8x176xf32>
      %cst_73 = arith.constant dense<0.000000e+00> : vector<8xf32>
      %139 = vector.multi_reduction <add>, %138, %cst_73 [1] : vector<8x176xf32> to vector<8xf32>
      %140 = vector.shape_cast %139 : vector<8xf32> to vector<8x1xf32>
      %141 = math.sqrt %140 : vector<8x1xf32>
      %142 = arith.mulf %137, %141 : vector<8x1xf32>
      %cst_74 = arith.constant 9.99999993E-9 : f32
      %143 = vector.broadcast %cst_74 : f32 to vector<8x1xf32>
      %144 = arith.maximumf %142, %143 : vector<8x1xf32>
      %145 = arith.divf %133, %144 : vector<8x1xf32>
      %146 = arith.index_cast %arg26 : i32 to index
      %c0_75 = arith.constant 0 : index
      %c0_76 = arith.constant 0 : index
      %147 = vector.load %arg3[%146, %c0_75, %c0_76] : memref<3x8x1xf32, #tpu.memory_space<vmem>>, vector<1x8x1xf32>
      %148 = vector.shape_cast %147 : vector<1x8x1xf32> to vector<8x1xf32>
      %149 = arith.index_cast %arg26 : i32 to index
      %c0_77 = arith.constant 0 : index
      %c0_78 = arith.constant 0 : index
      %150 = vector.load %arg4[%149, %c0_77, %c0_78] : memref<3x8x1xf32, #tpu.memory_space<vmem>>, vector<1x8x1xf32>
      %151 = vector.shape_cast %150 : vector<1x8x1xf32> to vector<8x1xf32>
      %152 = arith.index_cast %arg26 : i32 to index
      %c0_79 = arith.constant 0 : index
      %c0_80 = arith.constant 0 : index
      %153 = vector.load %arg5[%152, %c0_79, %c0_80] : memref<3x8x1xf32, #tpu.memory_space<vmem>>, vector<1x8x1xf32>
      %154 = vector.shape_cast %153 : vector<1x8x1xf32> to vector<8x1xf32>
      %155 = arith.subf %105, %102 : vector<8x24xf32>
      %156 = arith.mulf %155, %155 : vector<8x24xf32>
      %cst_81 = arith.constant dense<0.000000e+00> : vector<8xf32>
      %157 = vector.multi_reduction <add>, %156, %cst_81 [1] : vector<8x24xf32> to vector<8xf32>
      %158 = vector.shape_cast %157 : vector<8xf32> to vector<8x1xf32>
      %159 = arith.mulf %158, %151 : vector<8x1xf32>
      %160 = vector.shape_cast %159 : vector<8x1xf32> to vector<1x8x1xf32>
      %cst_82 = arith.constant dense<0.000000e+00> : vector<1xf32>
      %161 = vector.multi_reduction <add>, %160, %cst_82 [1, 2] : vector<1x8x1xf32> to vector<1xf32>
      %162 = vector.shape_cast %161 : vector<1xf32> to vector<1x1x1xf32>
      %163 = vector.extract %162[0, 0, 0] : f32 from vector<1x1x1xf32>
      %164 = vector.broadcast %163 : f32 to vector<1x1xf32>
      %165 = arith.addf %arg32, %164 : vector<1x1xf32>
      %cst_83 = arith.constant 1.000000e+00 : f32
      %166 = vector.broadcast %cst_83 : f32 to vector<8x40xf32>
      %167 = arith.cmpf oeq, %56, %166 : vector<8x40xf32>
      %cst_84 = arith.constant 1.000000e+00 : f32
      %cst_85 = arith.constant 0.000000e+00 : f32
      %168 = vector.broadcast %cst_84 : f32 to vector<8x40xf32>
      %169 = vector.broadcast %cst_85 : f32 to vector<8x40xf32>
      %170 = arith.select %167, %168, %169 : vector<8x40xi1>, vector<8x40xf32>
      %cst_86 = arith.constant dense<0xFF800000> : vector<40xf32>
      %171 = vector.multi_reduction <maximumf>, %170, %cst_86 [0] : vector<8x40xf32> to vector<40xf32>
      %172 = vector.shape_cast %171 : vector<40xf32> to vector<1x40xf32>
      %c0_87 = arith.constant 0 : index
      %c0_88 = arith.constant 0 : index
      %173 = vector.load %arg23[%c0_87, %c0_88] : memref<1x40xf32, #tpu.memory_space<vmem>>, vector<1x40xf32>
      %174 = arith.mulf %172, %173 : vector<1x40xf32>
      %175 = vector.shape_cast %174 : vector<1x40xf32> to vector<1x1x40xf32>
      %cst_89 = arith.constant dense<0.000000e+00> : vector<1xf32>
      %176 = vector.multi_reduction <add>, %175, %cst_89 [1, 2] : vector<1x1x40xf32> to vector<1xf32>
      %177 = vector.shape_cast %176 : vector<1xf32> to vector<1x1x1xf32>
      %178 = vector.extract %177[0, 0, 0] : f32 from vector<1x1x1xf32>
      %179 = vector.broadcast %178 : f32 to vector<1x1xf32>
      %180 = arith.addf %arg31, %179 : vector<1x1xf32>
      %181 = vector.broadcast %148 : vector<8x1xf32> to vector<8x24xf32>
      %182 = arith.mulf %97, %181 : vector<8x24xf32>
      %cst_90 = arith.constant dense<0.000000e+00> : vector<24x24xf32>
      %183 = tpu.matmul %182, %182, %cst_90 {dimension_numbers = #tpu.dot_dimension_numbers<[0], [0], [1], [1], [0, 1, 1, 1], [], []>} : vector<8x24xf32>, vector<8x24xf32>, vector<24x24xf32> -> vector<24x24xf32>
      %184 = arith.negf %183 : vector<24x24xf32>
      %185 = math.exp %184 : vector<24x24xf32>
      %cst_91 = arith.constant 1.000000e+00 : f32
      %186 = vector.broadcast %cst_91 : f32 to vector<24x24xf32>
      %187 = arith.addf %186, %185 : vector<24x24xf32>
      %188 = arith.divf %186, %187 : vector<24x24xf32>
      %c0_92 = arith.constant 0 : index
      %c0_93 = arith.constant 0 : index
      %189 = vector.load %arg24[%c0_92, %c0_93] : memref<1x24xf32, #tpu.memory_space<vmem>>, vector<1x24xf32>
      %190 = vector.broadcast %189 : vector<1x24xf32> to vector<24x24xf32>
      %191 = arith.mulf %188, %190 : vector<24x24xf32>
      %192 = vector.shape_cast %191 : vector<24x24xf32> to vector<1x24x24xf32>
      %cst_94 = arith.constant dense<0.000000e+00> : vector<1xf32>
      %193 = vector.multi_reduction <add>, %192, %cst_94 [1, 2] : vector<1x24x24xf32> to vector<1xf32>
      %194 = vector.shape_cast %193 : vector<1xf32> to vector<1x1x1xf32>
      %195 = vector.extract %194[0, 0, 0] : f32 from vector<1x1x1xf32>
      %196 = vector.broadcast %195 : f32 to vector<1x1xf32>
      %197 = arith.addf %arg33, %196 : vector<1x1xf32>
      %cst_95 = arith.constant 5.000000e-01 : f32
      %198 = vector.broadcast %cst_95 : f32 to vector<8x1xf32>
      %199 = arith.mulf %198, %145 : vector<8x1xf32>
      %cst_96 = arith.constant 5.000000e-01 : f32
      %200 = vector.broadcast %cst_96 : f32 to vector<8x1xf32>
      %201 = arith.addf %200, %199 : vector<8x1xf32>
      %202 = arith.mulf %201, %154 : vector<8x1xf32>
      %203 = vector.shape_cast %202 : vector<8x1xf32> to vector<1x8x1xf32>
      %cst_97 = arith.constant dense<0.000000e+00> : vector<1xf32>
      %204 = vector.multi_reduction <add>, %203, %cst_97 [1, 2] : vector<1x8x1xf32> to vector<1xf32>
      %205 = vector.shape_cast %204 : vector<1xf32> to vector<1x1x1xf32>
      %206 = vector.extract %205[0, 0, 0] : f32 from vector<1x1x1xf32>
      %207 = vector.broadcast %206 : f32 to vector<1x1xf32>
      %208 = arith.addf %arg30, %207 : vector<1x1xf32>
      scf.yield %90, %88, %125, %208, %180, %165, %197 : vector<8x32xf32>, vector<8x32xf32>, vector<8x176xf32>, vector<1x1xf32>, vector<1x1xf32>, vector<1x1xf32>, vector<1x1xf32>
    }
    %c3_i32_4 = arith.constant 3 : i32
    %7 = arith.addf %6#3, %6#4 : vector<1x1xf32>
    %8 = arith.addf %7, %6#5 : vector<1x1xf32>
    %9 = arith.addf %8, %6#6 : vector<1x1xf32>
    %10 = tpu.iota {dimensions = array<i32: 1>} : vector<8x128xi32>
    %11 = tpu.iota {dimensions = array<i32: 0>} : vector<8x128xi32>
    %c0_i32_5 = arith.constant 0 : i32
    %12 = vector.broadcast %c0_i32_5 : i32 to vector<8x128xi32>
    %13 = arith.cmpi eq, %11, %12 : vector<8x128xi32>
    %c0_i32_6 = arith.constant 0 : i32
    %14 = vector.broadcast %c0_i32_6 : i32 to vector<8x128xi32>
    %15 = arith.cmpi eq, %10, %14 : vector<8x128xi32>
    %16 = arith.andi %13, %15 : vector<8x128xi1>
    %cst_7 = arith.constant 0.000000e+00 : f32
    %17 = vector.shape_cast %9 : vector<1x1xf32> to vector<1x1xf32>
    %18 = vector.broadcast %17 : vector<1x1xf32> to vector<8x128xf32>
    %19 = vector.broadcast %cst_7 : f32 to vector<8x128xf32>
    %20 = arith.select %16, %18, %19 : vector<8x128xi1>, vector<8x128xf32>
    %c1_i32_8 = arith.constant 1 : i32
    %21 = vector.broadcast %c1_i32_8 : i32 to vector<8x128xi32>
    %22 = arith.cmpi eq, %10, %21 : vector<8x128xi32>
    %23 = arith.andi %13, %22 : vector<8x128xi1>
    %cst_9 = arith.constant 0.000000e+00 : f32
    %24 = vector.shape_cast %6#3 : vector<1x1xf32> to vector<1x1xf32>
    %25 = vector.broadcast %24 : vector<1x1xf32> to vector<8x128xf32>
    %26 = vector.broadcast %cst_9 : f32 to vector<8x128xf32>
    %27 = arith.select %23, %25, %26 : vector<8x128xi1>, vector<8x128xf32>
    %28 = arith.addf %20, %27 : vector<8x128xf32>
    %c2_i32 = arith.constant 2 : i32
    %29 = vector.broadcast %c2_i32 : i32 to vector<8x128xi32>
    %30 = arith.cmpi eq, %10, %29 : vector<8x128xi32>
    %31 = arith.andi %13, %30 : vector<8x128xi1>
    %cst_10 = arith.constant 0.000000e+00 : f32
    %32 = vector.shape_cast %6#4 : vector<1x1xf32> to vector<1x1xf32>
    %33 = vector.broadcast %32 : vector<1x1xf32> to vector<8x128xf32>
    %34 = vector.broadcast %cst_10 : f32 to vector<8x128xf32>
    %35 = arith.select %31, %33, %34 : vector<8x128xi1>, vector<8x128xf32>
    %36 = arith.addf %28, %35 : vector<8x128xf32>
    %c3_i32_11 = arith.constant 3 : i32
    %37 = vector.broadcast %c3_i32_11 : i32 to vector<8x128xi32>
    %38 = arith.cmpi eq, %10, %37 : vector<8x128xi32>
    %39 = arith.andi %13, %38 : vector<8x128xi1>
    %cst_12 = arith.constant 0.000000e+00 : f32
    %40 = vector.shape_cast %6#5 : vector<1x1xf32> to vector<1x1xf32>
    %41 = vector.broadcast %40 : vector<1x1xf32> to vector<8x128xf32>
    %42 = vector.broadcast %cst_12 : f32 to vector<8x128xf32>
    %43 = arith.select %39, %41, %42 : vector<8x128xi1>, vector<8x128xf32>
    %44 = arith.addf %36, %43 : vector<8x128xf32>
    %c4_i32 = arith.constant 4 : i32
    %45 = vector.broadcast %c4_i32 : i32 to vector<8x128xi32>
    %46 = arith.cmpi eq, %10, %45 : vector<8x128xi32>
    %47 = arith.andi %13, %46 : vector<8x128xi1>
    %cst_13 = arith.constant 0.000000e+00 : f32
    %48 = vector.shape_cast %6#6 : vector<1x1xf32> to vector<1x1xf32>
    %49 = vector.broadcast %48 : vector<1x1xf32> to vector<8x128xf32>
    %50 = vector.broadcast %cst_13 : f32 to vector<8x128xf32>
    %51 = arith.select %47, %49, %50 : vector<8x128xi1>, vector<8x128xf32>
    %52 = arith.addf %44, %51 : vector<8x128xf32>
    %c0_14 = arith.constant 0 : index
    %c0_15 = arith.constant 0 : index
    %53 = vector.load %arg25[%c0_14, %c0_15] : memref<8x128xf32, #tpu.memory_space<vmem>>, vector<8x128xf32>
    tpu.vector_store %arg25[%c0_14, %c0_15], %52 {strides = array<i32>} : memref<8x128xf32, #tpu.memory_space<vmem>>, vector<8x128xf32>,
    return
  }
}

</mosaic_0001>

<bundles_post_ra>
// kernel: tpu_custom_call.1
= control target key start
LH: loop header
LB: loop body
LE: loop exit
PB: predicated region body
PF: predicated region fallthrough
CT: control target
= control target key end

     0   :  { %s3554_s0 = inlined_call_operand.hbm [shape: f32[3,8,176], index: 0, kind: input, shape index: {}]   ;;  %s3555_s1 = inlined_call_operand.hbm [shape: f32[3,8,40], index: 1, kind: input, shape index: {}]   ;;  %s3556_s2 = inlined_call_operand.hbm [shape: f32[3,8,24], index: 2, kind: input, shape index: {}]   ;;  %s3557_s3 = inlined_call_operand.vmem [shape: f32[3,8,1], index: 3, kind: input, shape index: {}]   ;;  %s3558_s4 = inlined_call_operand.vmem [shape: f32[3,8,1], index: 4, kind: input, shape index: {}]   ;;  %s3559_s5 = inlined_call_operand.vmem [shape: f32[3,8,1], index: 5, kind: input, shape index: {}]   ;;  %s3560_s6 = inlined_call_operand.hbm [shape: f32[40,176], index: 6, kind: input, shape index: {}]   ;;  %s3561_s7 = inlined_call_operand.hbm [shape: f32[24,176], index: 7, kind: input, shape index: {}]   ;;  %s3562_s8 = inlined_call_operand.vmem [shape: f32[176,24], index: 8, kind: input, shape index: {}]   ;;  %s3563_s9 = inlined_call_operand.hbm [shape: f32[176,176], index: 9, kind: input, shape index: {}]   ;;  %s3564_s10 = inlined_call_operand.hbm [shape: f32[176,176], index: 10, kind: input, shape index: {}]   ;;  %s3565_s11 = inlined_call_operand.vmem [shape: f32[1,176], index: 11, kind: input, shape index: {}]   ;;  %s3566_s12 = inlined_call_operand.hbm [shape: f32[176,128], index: 12, kind: input, shape index: {}]   ;;  %s3567_s13 = inlined_call_operand.hbm [shape: f32[32,128], index: 13, kind: input, shape index: {}]   ;;  %s3568_s14 = inlined_call_operand.vmem [shape: f32[1,128], index: 14, kind: input, shape index: {}]   ;;  %s3569_s15 = inlined_call_operand.hbm [shape: f32[32,176], index: 15, kind: input, shape index: {}]   ;;  %s3570_s16 = inlined_call_operand.vmem [shape: f32[1,176], index: 16, kind: input, shape index: {}]   ;;  %s3571_s17 = inlined_call_operand.vmem [shape: f32[176,176], index: 17, kind: input, shape index: {}]   ;;  %s3572_s18 = inlined_call_operand.hbm [shape: f32[176,176], index: 18, kind: input, shape index: {}]   ;;  %s3573_s19 = inlined_call_operand.hbm [shape: f32[176,176], index: 19, kind: input, shape index: {}]   ;;  %s3574_s20 = inlined_call_operand.vmem [shape: f32[1,176], index: 20, kind: input, shape index: {}]   ;;  %s3575_s21 = inlined_call_operand.vmem [shape: f32[1,176], index: 21, kind: input, shape index: {}]   ;;  %s3576_s22 = inlined_call_operand.vmem [shape: f32[1,176], index: 22, kind: input, shape index: {}]   ;;  %s3577_s23 = inlined_call_operand.vmem [shape: f32[1,40], index: 23, kind: input, shape index: {}]   ;;  %s3578_s24 = inlined_call_operand.vmem [shape: f32[1,24], index: 24, kind: input, shape index: {}]   ;;  %s3579_s25 = inlined_call_operand.hbm [shape: f32[8,128], index: 25, kind: output, shape index: {}]  }
   0x1   :  { %3590 = sst [smem:[#allocation31_spill]] %s3554_s0 }
   0x2   :  { %3591 = sst [smem:[#allocation32_spill]] %s3555_s1 }
   0x3   :  { %3592 = sst [smem:[#allocation33_spill]] %s3556_s2 }
   0x4   :  { %3593 = sst [smem:[#allocation34_spill]] %s3557_s3 }
   0x5   :  { %3594 = sst [smem:[#allocation35_spill]] %s3558_s4 }
   0x6   :  { %3595 = sst [smem:[#allocation36_spill]] %s3559_s5 }
   0x7   :  { %3596 = sst [smem:[#allocation37_spill]] %s3560_s6 }
   0x8   :  { %3597 = sst [smem:[#allocation38_spill]] %s3561_s7 }
   0x9   :  { %3598 = sst [smem:[#allocation39_spill]] %s3562_s8 }
   0xa   :  { %3599 = sst [smem:[#allocation40_spill]] %s3563_s9 }
   0xb   :  { %3600 = sst [smem:[#allocation41_spill]] %s3577_s23 }
   0xc   :  { %3601 = sst [smem:[#allocation42_spill]] %s3578_s24 }
   0xd   :  { %3602 = sst [smem:[#allocation43_spill]] %s3579_s25 }
   0xe   :  { %30 = vsyncpa [#allocation3], 0 }
   0xf   :  { %31 = vsyncpa [#allocation6], 0 }
  0x10   :  { %32 = vsyncpa [#allocation9], 0 }
  0x11   :  { %33 = vsyncpa [#allocation12], 0 }
  0x12   :  { %34 = vsyncpa [#allocation15], 0 }
  0x13   :  { %35 = vsyncpa [#allocation18], 0 }
  0x14   :  { %36 = vsyncpa [#allocation21], 0 }
  0x15   :  { %37 = vsyncpa [#allocation4], 0  ;;  %s2736_s29 = smov [#allocation5]   ;;  %s3603_s7 = sld [smem:[#allocation32_spill]] }
  0x16   :  { %s55_s2 = sshll.u32 %s2736_s29, 4  ;;  %s56_s2 = int_to_ptr.vmem [resolvable:$true] %s55_s2 }
  0x1b   :  { %s2362_s3 = scalar_lea.hbm %s3603_s7, 384 }
  0x1c   :  { %p2363_p0 = scmp.ne.s32.totalorder %s3603_s7, %s2362_s3  ;;  %p2366_p1 = scmp.lt.u32.totalorder %s2362_s3, %s3603_s7 }
  0x1e   :  { %p2368_p2 = pnand %p2366_p1, %p2363_p0 }
  0x20   :  { %2371 = shalt.err (!%p2368_p2)
}
  0x21   :  { %s2372_s4 = scalar_lea.vmem %s56_s2, 384  ;;  %p2377_p4 = scmp.lt.s32.totalorder %s56_s2, %s56_s2 }
  0x22   :  { %p2373_p3 = scmp.ne.s32.totalorder %s56_s2, %s2372_s4  ;;  %p2378_p5 = scmp.lt.s32.totalorder %s2372_s4, %s2372_s4 }
  0x24   :  { %p2379_p6 = por %p2378_p5, %p2377_p4 }
  0x26   :  { %p2380_p7 = pnand %p2379_p6, %p2373_p3 }
  0x28   :  { %2383 = shalt.err (!%p2380_p7)
}
  0x29   :  { %s3588_s28 = smov 128   ;;  %s2738_s9 = smov 8  }
  0x2a   :  { %61 = dma.hbm_to_vmem [thread:$0]  %s3603_s7, 384, %s56_s2, [#allocation6], %s3588_s28, %s3588_s28, %s2738_s9  }
  0x2b   :  { %s2739_s29 = smov [#allocation8]   ;;  %s2740_s30 = smov [#allocation11]  }
  0x2c   :  { %s85_s6 = sshll.u32 %s2739_s29, 4  ;;  %s111_s3 = sshll.u32 %s2740_s30, 4  ;;  %s86_s6 = int_to_ptr.vmem [resolvable:$true] %s85_s6  ;;  %s112_s3 = int_to_ptr.vmem [resolvable:$true] %s111_s3 }
  0x2d   :  { %s3604_s8 = sld [smem:[#allocation37_spill]] }
  0x33   :  { %s2384_s27 = scalar_lea.hbm %s3604_s8, 1280 }
  0x34   :  { %p2385_p8 = scmp.ne.s32.totalorder %s3604_s8, %s2384_s27  ;;  %p2388_p9 = scmp.lt.u32.totalorder %s2384_s27, %s3604_s8 }
  0x36   :  { %p2390_p10 = pnand %p2388_p9, %p2385_p8 }
  0x38   :  { %2393 = shalt.err (!%p2390_p10)
}
  0x39   :  { %s2394_s2 = scalar_lea.vmem %s86_s6, 1280  ;;  %p2399_p12 = scmp.lt.s32.totalorder %s86_s6, %s86_s6 }
  0x3a   :  { %p2395_p11 = scmp.ne.s32.totalorder %s86_s6, %s2394_s2  ;;  %p2400_p13 = scmp.lt.s32.totalorder %s2394_s2, %s2394_s2 }
  0x3c   :  { %p2401_p0 = por %p2400_p13, %p2399_p12 }
  0x3e   :  { %p2402_p1 = pnand %p2401_p0, %p2395_p11 }
  0x40   :  { %2405 = shalt.err (!%p2402_p1)
}
  0x41   :  { %s2741_s7 = smov 256   ;;  %s2742_s5 = smov 16  }
  0x42   :  { %91 = dma.hbm_to_vmem [thread:$0]  %s3604_s8, 1280, %s86_s6, [#allocation9], %s2741_s7, %s2741_s7, %s2742_s5  }
  0x43   :  { %s3605_s29 = sld [smem:[#allocation40_spill]] }
  0x49   :  { %s2406_s30 = scalar_lea.hbm %s3605_s29, 5632 }
  0x4a   :  { %p2407_p2 = scmp.ne.s32.totalorder %s3605_s29, %s2406_s30  ;;  %p2410_p3 = scmp.lt.u32.totalorder %s2406_s30, %s3605_s29 }
  0x4c   :  { %p2412_p4 = pnand %p2410_p3, %p2407_p2 }
  0x4e   :  { %2415 = shalt.err (!%p2412_p4)
}
  0x4f   :  { %s2416_s2 = scalar_lea.vmem %s112_s3, 5632  ;;  %p2421_p6 = scmp.lt.s32.totalorder %s112_s3, %s112_s3 }
  0x50   :  { %p2417_p5 = scmp.ne.s32.totalorder %s112_s3, %s2416_s2  ;;  %p2422_p7 = scmp.lt.s32.totalorder %s2416_s2, %s2416_s2 }
  0x52   :  { %p2423_p8 = por %p2422_p7, %p2421_p6 }
  0x54   :  { %p2424_p9 = pnand %p2423_p8, %p2417_p5 }
  0x56   :  { %2427 = shalt.err (!%p2424_p9)
}
  0x57   :  { %117 = dma.hbm_to_vmem [thread:$0]  %s3605_s29, 5632, %s112_s3, [#allocation12], %s2741_s7, %s2741_s7, %s2742_s5  }
  0x58   :  { %s2743_s25 = smov [#allocation14]   ;;  %s2744_s23 = smov [#allocation17]  }
  0x59   :  { %s137_s0 = sshll.u32 %s2743_s25, 4  ;;  %s163_s24 = sshll.u32 %s2744_s23, 4  ;;  %s138_s0 = int_to_ptr.vmem [resolvable:$true] %s137_s0  ;;  %s164_s24 = int_to_ptr.vmem [resolvable:$true] %s163_s24 }
  0x5a   :  { %s2428_s1 = scalar_lea.hbm %s3566_s12, 2816 }
  0x5b   :  { %p2429_p10 = scmp.ne.s32.totalorder %s3566_s12, %s2428_s1  ;;  %p2432_p11 = scmp.lt.u32.totalorder %s2428_s1, %s3566_s12 }
  0x5d   :  { %p2434_p12 = pnand %p2432_p11, %p2429_p10 }
  0x5f   :  { %2437 = shalt.err (!%p2434_p12)
}
  0x60   :  { %s2438_s3 = scalar_lea.vmem %s138_s0, 2816  ;;  %p2443_p0 = scmp.lt.s32.totalorder %s138_s0, %s138_s0 }
  0x61   :  { %p2439_p13 = scmp.ne.s32.totalorder %s138_s0, %s2438_s3  ;;  %p2444_p1 = scmp.lt.s32.totalorder %s2438_s3, %s2438_s3 }
  0x63   :  { %p2445_p2 = por %p2444_p1, %p2443_p0 }
  0x65   :  { %p2446_p3 = pnand %p2445_p2, %p2439_p13 }
  0x67   :  { %2449 = shalt.err (!%p2446_p3)
}
  0x68   :  { %s3606_s29 = smov 128   ;;  %s2450_s23 = scalar_lea.hbm %s3569_s15, 1024 }
  0x69   :  { %143 = dma.hbm_to_vmem [thread:$0]  %s3566_s12, 2816, %s138_s0, [#allocation15], %s3606_s29, %s3606_s29, %s2738_s9  }
  0x6a   :  { %p2451_p4 = scmp.ne.s32.totalorder %s3569_s15, %s2450_s23  ;;  %p2454_p5 = scmp.lt.u32.totalorder %s2450_s23, %s3569_s15 }
  0x6c   :  { %p2456_p6 = pnand %p2454_p5, %p2451_p4 }
  0x6e   :  { %2459 = shalt.err (!%p2456_p6)
}
  0x6f   :  { %s2460_s4 = scalar_lea.vmem %s164_s24, 1024  ;;  %p2465_p8 = scmp.lt.s32.totalorder %s164_s24, %s164_s24 }
  0x70   :  { %p2461_p7 = scmp.ne.s32.totalorder %s164_s24, %s2460_s4  ;;  %p2466_p9 = scmp.lt.s32.totalorder %s2460_s4, %s2460_s4 }
  0x72   :  { %p2467_p10 = por %p2466_p9, %p2465_p8 }
  0x74   :  { %p2468_p11 = pnand %p2467_p10, %p2461_p7 }
  0x76   :  { %2471 = shalt.err (!%p2468_p11)
}
  0x77   :  { %169 = dma.hbm_to_vmem [thread:$0]  %s3569_s15, 1024, %s164_s24, [#allocation18], %s2741_s7, %s2741_s7, %s2742_s5  }
  0x78   :  { %s2745_s2 = smov [#allocation2]   ;;  %s2746_s6 = smov [#allocation7]  }
  0x79   :  { %s43_s3 = sshll.u32 %s2745_s2, 4  ;;  %s67_s8 = sshll.u32 %s2746_s6, 4  ;;  %s44_s3 = int_to_ptr.vmem [resolvable:$true] %s43_s3  ;;  %s68_s8 = int_to_ptr.vmem [resolvable:$true] %s67_s8 }
  0x7a   :  { %s3607_s23 = sld [smem:[#allocation31_spill]] }
  0x80   :  { %s2472_s30 = scalar_lea.hbm %s3607_s23, 768 }
  0x81   :  { %p2473_p12 = scmp.ne.s32.totalorder %s3607_s23, %s2472_s30  ;;  %p2476_p13 = scmp.lt.u32.totalorder %s2472_s30, %s3607_s23 }
  0x83   :  { %p2478_p0 = pnand %p2476_p13, %p2473_p12 }
  0x85   :  { %2481 = shalt.err (!%p2478_p0)
}
  0x86   :  { %s2482_s15 = scalar_lea.vmem %s44_s3, 768  ;;  %p2487_p2 = scmp.lt.s32.totalorder %s44_s3, %s44_s3 }
  0x87   :  { %p2483_p1 = scmp.ne.s32.totalorder %s44_s3, %s2482_s15  ;;  %p2488_p3 = scmp.lt.s32.totalorder %s2482_s15, %s2482_s15 }
  0x89   :  { %p2489_p4 = por %p2488_p3, %p2487_p2 }
  0x8b   :  { %p2490_p5 = pnand %p2489_p4, %p2483_p1 }
  0x8d   :  { %2493 = shalt.err (!%p2490_p5)
}
  0x8e   :  { %49 = dma.hbm_to_vmem [thread:$0]  %s3607_s23, 768, %s44_s3, [#allocation3], %s2741_s7, %s2741_s7, %s2742_s5  }
  0x8f   :  { %s3608_s6 = sld [smem:[#allocation33_spill]] }
  0x95   :  { %s2494_s25 = scalar_lea.hbm %s3608_s6, 384 }
  0x96   :  { %p2495_p6 = scmp.ne.s32.totalorder %s3608_s6, %s2494_s25  ;;  %p2498_p7 = scmp.lt.u32.totalorder %s2494_s25, %s3608_s6 }
  0x98   :  { %p2500_p8 = pnand %p2498_p7, %p2495_p6 }
  0x9a   :  { %2503 = shalt.err (!%p2500_p8)
}
  0x9b   :  { %s2504_s27 = scalar_lea.vmem %s68_s8, 384  ;;  %p2509_p10 = scmp.lt.s32.totalorder %s68_s8, %s68_s8 }
  0x9c   :  { %p2505_p9 = scmp.ne.s32.totalorder %s68_s8, %s2504_s27  ;;  %p2510_p11 = scmp.lt.s32.totalorder %s2504_s27, %s2504_s27 }
  0x9e   :  { %p2511_p12 = por %p2510_p11, %p2509_p10 }
  0xa0   :  { %p2512_p13 = pnand %p2511_p12, %p2505_p9 }
  0xa2   :  { %2515 = shalt.err (!%p2512_p13)
}
  0xa3   :  { %73 = dma.hbm_to_vmem [thread:$0]  %s3608_s6, 384, %s68_s8, [#allocation6], %s3606_s29, %s3606_s29, %s2738_s9  }
  0xa4   :  { %s2747_s4 = smov [#allocation10]   ;;  %s2748_s24 = smov [#allocation13]  }
  0xa5   :  { %s97_s15 = sshll.u32 %s2747_s4, 4  ;;  %s123_s12 = sshll.u32 %s2748_s24, 4  ;;  %s98_s15 = int_to_ptr.vmem [resolvable:$true] %s97_s15  ;;  %s124_s12 = int_to_ptr.vmem [resolvable:$true] %s123_s12 }
  0xa6   :  { %s3609_s25 = sld [smem:[#allocation38_spill]] }
  0xac   :  { %s2516_s28 = scalar_lea.hbm %s3609_s25, 768 }
  0xad   :  { %p2517_p0 = scmp.ne.s32.totalorder %s3609_s25, %s2516_s28  ;;  %p2520_p1 = scmp.lt.u32.totalorder %s2516_s28, %s3609_s25 }
  0xaf   :  { %p2522_p2 = pnand %p2520_p1, %p2517_p0 }
  0xb1   :  { %2525 = shalt.err (!%p2522_p2)
}
  0xb2   :  { %s2526_s8 = scalar_lea.vmem %s98_s15, 768  ;;  %p2531_p4 = scmp.lt.s32.totalorder %s98_s15, %s98_s15 }
  0xb3   :  { %p2527_p3 = scmp.ne.s32.totalorder %s98_s15, %s2526_s8  ;;  %p2532_p5 = scmp.lt.s32.totalorder %s2526_s8, %s2526_s8 }
  0xb5   :  { %p2533_p6 = por %p2532_p5, %p2531_p4 }
  0xb7   :  { %p2534_p7 = pnand %p2533_p6, %p2527_p3 }
  0xb9   :  { %2537 = shalt.err (!%p2534_p7)
}
  0xba   :  { %103 = dma.hbm_to_vmem [thread:$0]  %s3609_s25, 768, %s98_s15, [#allocation9], %s2741_s7, %s2741_s7, %s2742_s5  }
  0xbb   :  { %s2538_s24 = scalar_lea.hbm %s3564_s10, 5632 }
  0xbc   :  { %p2539_p8 = scmp.ne.s32.totalorder %s3564_s10, %s2538_s24  ;;  %p2542_p9 = scmp.lt.u32.totalorder %s2538_s24, %s3564_s10 }
  0xbe   :  { %p2544_p10 = pnand %p2542_p9, %p2539_p8 }
  0xc0   :  { %2547 = shalt.err (!%p2544_p10)
}
  0xc1   :  { %s2548_s26 = scalar_lea.vmem %s124_s12, 5632  ;;  %p2553_p12 = scmp.lt.s32.totalorder %s124_s12, %s124_s12 }
  0xc2   :  { %p2549_p11 = scmp.ne.s32.totalorder %s124_s12, %s2548_s26  ;;  %p2554_p13 = scmp.lt.s32.totalorder %s2548_s26, %s2548_s26 }
  0xc4   :  { %p2555_p0 = por %p2554_p13, %p2553_p12 }
  0xc6   :  { %p2556_p1 = pnand %p2555_p0, %p2549_p11 }
  0xc8   :  { %2559 = shalt.err (!%p2556_p1)
}
  0xc9   :  { %129 = dma.hbm_to_vmem [thread:$0]  %s3564_s10, 5632, %s124_s12, [#allocation12], %s2741_s7, %s2741_s7, %s2742_s5  }
  0xca   :  { %s2749_s1 = smov [#allocation16]   ;;  %s2750_s8 = smov [#allocation19]  }
  0xcb   :  { %s149_s27 = sshll.u32 %s2749_s1, 4  ;;  %s179_s6 = sshll.u32 %s2750_s8, 4  ;;  %s150_s27 = int_to_ptr.vmem [resolvable:$true] %s149_s27  ;;  %s180_s6 = int_to_ptr.vmem [resolvable:$true] %s179_s6 }
  0xcc   :  { %s2560_s4 = scalar_lea.hbm %s3567_s13, 512 }
  0xcd   :  { %p2561_p2 = scmp.ne.s32.totalorder %s3567_s13, %s2560_s4  ;;  %p2564_p3 = scmp.lt.u32.totalorder %s2560_s4, %s3567_s13 }
  0xcf   :  { %p2566_p4 = pnand %p2564_p3, %p2561_p2 }
  0xd1   :  { %2569 = shalt.err (!%p2566_p4)
}
  0xd2   :  { %s2570_s10 = scalar_lea.vmem %s150_s27, 512  ;;  %p2575_p6 = scmp.lt.s32.totalorder %s150_s27, %s150_s27 }
  0xd3   :  { %p2571_p5 = scmp.ne.s32.totalorder %s150_s27, %s2570_s10  ;;  %p2576_p7 = scmp.lt.s32.totalorder %s2570_s10, %s2570_s10 }
  0xd5   :  { %p2577_p8 = por %p2576_p7, %p2575_p6 }
  0xd7   :  { %p2578_p9 = pnand %p2577_p8, %p2571_p5 }
  0xd9   :  { %2581 = shalt.err (!%p2578_p9)
}
  0xda   :  { %155 = dma.hbm_to_vmem [thread:$0]  %s3567_s13, 512, %s150_s27, [#allocation15], %s3606_s29, %s3606_s29, %s2738_s9  }
  0xdb   :  { %s2582_s25 = scalar_lea.hbm %s3572_s18, 5632 }
  0xdc   :  { %p2583_p10 = scmp.ne.s32.totalorder %s3572_s18, %s2582_s25  ;;  %p2586_p11 = scmp.lt.u32.totalorder %s2582_s25, %s3572_s18 }
  0xde   :  { %p2588_p12 = pnand %p2586_p11, %p2583_p10 }
  0xe0   :  { %2591 = shalt.err (!%p2588_p12)
}
  0xe1   :  { %s2592_s4 = scalar_lea.vmem %s180_s6, 5632  ;;  %p2597_p0 = scmp.lt.s32.totalorder %s180_s6, %s180_s6 }
  0xe2   :  { %p2593_p13 = scmp.ne.s32.totalorder %s180_s6, %s2592_s4  ;;  %p2598_p1 = scmp.lt.s32.totalorder %s2592_s4, %s2592_s4 }
  0xe4   :  { %p2599_p2 = por %p2598_p1, %p2597_p0 }
  0xe6   :  { %p2600_p3 = pnand %p2599_p2, %p2593_p13 }
  0xe8   :  { %2603 = shalt.err (!%p2600_p3)
}
  0xe9   :  { %185 = dma.hbm_to_vmem [thread:$0]  %s3572_s18, 5632, %s180_s6, [#allocation18], %s2741_s7, %s2741_s7, %s2742_s5  }
  0xea   :  { %s2751_s29 = smov [#allocation20]   ;;  %s2604_s2 = scalar_lea.hbm %s3573_s19, 5632 }
  0xeb   :  { %s191_s27 = sshll.u32 %s2751_s29, 4  ;;  %p2605_p4 = scmp.ne.s32.totalorder %s3573_s19, %s2604_s2  ;;  %s192_s27 = int_to_ptr.vmem [resolvable:$true] %s191_s27 }
  0xec   :  { %p2608_p5 = scmp.lt.u32.totalorder %s2604_s2, %s3573_s19 }
  0xee   :  { %p2610_p6 = pnand %p2608_p5, %p2605_p4 }
  0xf0   :  { %2613 = shalt.err (!%p2610_p6)
}
  0xf1   :  { %s2614_s26 = scalar_lea.vmem %s192_s27, 5632  ;;  %p2619_p8 = scmp.lt.s32.totalorder %s192_s27, %s192_s27 }
  0xf2   :  { %p2615_p7 = scmp.ne.s32.totalorder %s192_s27, %s2614_s26  ;;  %p2620_p9 = scmp.lt.s32.totalorder %s2614_s26, %s2614_s26 }
  0xf4   :  { %p2621_p10 = por %p2620_p9, %p2619_p8 }
  0xf6   :  { %p2622_p11 = pnand %p2621_p10, %p2615_p7 }
  0xf8   :  { %2625 = shalt.err (!%p2622_p11)
}
  0xf9   :  { %197 = dma.hbm_to_vmem [thread:$0]  %s3573_s19, 5632, %s192_s27, [#allocation21], %s2741_s7, %s2741_s7, %s2742_s5  }
  0xfa   :  { %2684 = dma.done.wait [#allocation3], 768  }
  0xfb   :  { %2685 = vsyncadd [#allocation3], 4294966528 }
  0xfc   :  { %2686 = dma.done.wait [#allocation6], 768  }
  0xfd   :  { %2687 = vsyncadd [#allocation6], 4294966528 }
  0xfe   :  { %2688 = dma.done.wait [#allocation9], 2048  }
  0xff   :  { %2689 = vsyncadd [#allocation9], 4294965248 }
 0x100   :  { %2690 = dma.done.wait [#allocation12], 11264  }
 0x101   :  { %2691 = vsyncadd [#allocation12], 4294956032 }
 0x102   :  { %2692 = dma.done.wait [#allocation15], 3328  }
 0x103   :  { %2693 = vsyncadd [#allocation15], 4294963968 }
 0x104   :  { %2694 = dma.done.wait [#allocation18], 6656  }
 0x105   :  { %2695 = vsyncadd [#allocation18], 4294960640 }
 0x106   :  { %2696 = dma.done.wait [#allocation21], 5632  }
 0x107   :  { %2697 = vsyncadd [#allocation21], 4294961664  ;;  %v244_v0 = vld [vmem:[#allocation2] sm:$0xff]   ;;  %v245_v1 = vld [vmem:[#allocation2 + $0x8] sm:$0xff]   ;;  %v3069_v2 = vmov 0.0   ;;  %v3071_v3 = vmov 0.0  }
 0x108   :  { %v3073_v4 = vmov 0.0   ;;  %v3075_v5 = vmov 0.0   ;;  %v3081_v6 = vmov 0.0   ;;  %v3083_v7 = vmov 0.0   ;;  %s3085_s19 = smov 0  }
 0x109 LB: > { %v264_v8 = vld [vmem:[#allocation8 + $0x8] sm:$0xff]  ;;  %v266_v9 = vld [vmem:[#allocation8 + $0x18] sm:$0xff]  ;;  %v263_v10 = vld [vmem:[#allocation8] sm:$0xff]  ;;  %v2752_v15 = vmov 0.0   ;;  %s3116_s7 = sshll.u32 %s2734_s19, 3  ;;  %vm273_vm1 = vcmask 326656   ;;  %s2734_s19 = sphi %s3085_s19, %s3318_s19   ;;  %v2730_v7 = vphi %v3083_v7, %v3173_v7   ;;  %v2726_v6 = vphi %v3081_v6, %v3168_v6   ;;  %v2722_v0 = vphi %v244_v0, %v3465_v0   ;;  %v2718_v1 = vphi %v245_v1, %v3467_v1   ;;  %v2714_v5 = vphi %v3075_v5, %v3619_v5   ;;  %v2710_v4 = vphi %v3073_v4, %v3618_v4   ;;  %v2706_v3 = vphi %v3071_v3, %v3617_v3   ;;  %v2702_v2 = vphi %v3069_v2, %v3616_v2  }
 0x10a   : > { %v1909_v11 = vpack.c.bf16 %v266_v9, %v264_v8  ;;  %v265_v12 = vld [vmem:[#allocation8 + $0x10] sm:$0xff]  ;;  %v268_v13 = vld [vmem:[#allocation8 + $0x28] sm:$0xff]  ;;  %v270_v14 = vld [vmem:[#allocation8 + $0x38] sm:$0xff]  ;;  %341 = vmatprep.mubr.f32.mxu0 %v2752_v15  ;;  %s261_s5 = scalar_lea.vmem [#allocation5], %s3116_s7  ;;  %vm436_vm2 = vcmask 392192   ;;  %vm2754_vm3 = vmmov 0  }
 0x10b   : > { %v1911_v16 = vpack.c.bf16 %v265_v12, %v263_v10  ;;  %v1913_v17 = vpack.c.bf16 %v270_v14, %v268_v13  ;;  %v267_v18 = vld [vmem:[#allocation8 + $0x20] sm:$0xff]  ;;  %v269_v19 = vld [vmem:[#allocation8 + $0x30] sm:$0xff]  ;;  %v272_v21 = vld [vmem:[#allocation8 + $0x48] sm:$0xff]  ;;  %s2755_s15 = smov 64   ;;  %vm628_vm4 = vcmask 261120   ;;  %s2756_s23 = smov 32  }
 0x10c   : > { %1910 = vmatprep.subr.bf16.mxu0 %v1909_v11  ;;  %v1915_v20 = vpack.c.bf16 %v269_v19, %v267_v18  ;;  %v262_v22 = vld [vmem:[%s261_s5] sm:$0xff]  ;;  %v393_v23 = vld [vmem:[#allocation13 + $0x8] sm:$0xff]  ;;  %v395_v24 = vld [vmem:[#allocation13 + $0x18] sm:$0xff]  ;;  %626 = vrot.lane.b32.xlu0 %v2730_v7, %s2755_s15  ;;  %s3610_s9 = sld [smem:[#allocation39_spill]]  ;;  %s3611_s24 = sld [smem:[#allocation34_spill]]  ;;  %vm1011_vm5 = vcmask 195584  }
 0x10d   : > { %1912 = vmatpush1.bf16.msra.mxu0 %v1911_v16  ;;  %vm1552_vm0 = vcmp.eq.f32.partialorder %v262_v22, 1.0  ;;  %v349_v25 = vld [vmem:[#allocation11 + $0x8] sm:$0xff]  ;;  %v351_v26 = vld [vmem:[#allocation11 + $0x18] sm:$0xff]  ;;  %v348_v27 = vld [vmem:[#allocation11] sm:$0xff]  ;;  %v1917_v42 = vpack.c.bf16 %v395_v24, %v393_v23  ;;  %s1003_s10 = scalar_lea.vmem [#allocation7], %s3116_s7  ;;  %s3318_s19 = sadd.s32 1, %s2734_s19  }
 0x10e   : > { %1914 = vmatprep.subr.bf16.mxu0 %v1913_v17  ;;  %v1553_v28 = vsel %vm1552_vm0, 1.0, %v2752_v15  ;;  %v392_v29 = vld [vmem:[#allocation13] sm:$0xff]  ;;  %v394_v30 = vld [vmem:[#allocation13 + $0x10] sm:$0xff]  ;;  %v1961_v31 = vpack.c.bf16 %v351_v26, %v349_v25  ;;  %v397_v35 = vld [vmem:[#allocation13 + $0x28] sm:$0xff]  ;;  %p1484_p12 = scmp.lt.s32.totalorder %s3318_s19, 2  ;;  %vm1614_vm6 = vcmask 64512  }
 0x10f   : > { %v350_v32 = vld [vmem:[#allocation11 + $0x10] sm:$0xff]  ;;  %v3121_v33 = vsel %vm273_vm1, %v1553_v28, -inf  ;;  %v399_v36 = vld [vmem:[#allocation13 + $0x38] sm:$0xff]  ;;  %v353_v37 = vld [vmem:[#allocation11 + $0x28] sm:$0xff]  ;;  %v1919_v44 = vpack.c.bf16 %v394_v30, %v392_v29  ;;  %s3612_s27 = sld [smem:[#allocation42_spill]]  ;;  %s3613_s2 = sld [smem:[#allocation35_spill]] }
 0x110   : > { %v1963_v34 = vpack.c.bf16 %v350_v32, %v348_v27  ;;  %1962 = vmatprep.subr.bf16.mxu1 %v1961_v31  ;;  %v355_v38 = vld [vmem:[#allocation11 + $0x38] sm:$0xff]  ;;  %v352_v39 = vld [vmem:[#allocation11 + $0x20] sm:$0xff]  ;;  %v354_v40 = vld [vmem:[#allocation11 + $0x30] sm:$0xff]  ;;  %v1921_v49 = vpack.c.bf16 %v399_v36, %v397_v35  ;;  %s1485_s18 = scalar_select %p1484_p12, %s3318_s19, 2  ;;  %vm1539_vm7 = vcmask 7168   ;;  %vm1563_vm8 = vcmask 319488  }
 0x111   : > { %1916 = vmatpush1.bf16.msra.mxu0 %v1915_v20  ;;  %v271_v41 = vld [vmem:[#allocation8 + $0x40] sm:$0xff]  ;;  %v1965_v43 = vpack.c.bf16 %v355_v38, %v353_v37  ;;  %v1967_v46 = vpack.c.bf16 %v354_v40, %v352_v39  ;;  %v357_v47 = vld [vmem:[#allocation11 + $0x48] sm:$0xff]  ;;  %v359_v48 = vld [vmem:[#allocation11 + $0x58] sm:$0xff]  ;;  %s3614_s30 = sld [smem:[#allocation41_spill]]  ;;  %s3615_s6 = sld [smem:[#allocation36_spill]] }
 0x112   : > { %285 = vmatprep.subr.mxu0 %v272_v21  ;;  %1964 = vmatpush1.bf16.msra.mxu1 %v1963_v34  ;;  %v396_v45 = vld [vmem:[#allocation13 + $0x20] sm:$0xff]  ;;  %v398_v50 = vld [vmem:[#allocation13 + $0x30] sm:$0xff]  ;;  %v1969_v51 = vpack.c.bf16 %v359_v48, %v357_v47  ;;  %v401_v54 = vld [vmem:[#allocation13 + $0x48] sm:$0xff]  ;;  %s1527_s0 = scalar_lea.vmem %s3611_s24, %s3116_s7  ;;  %s1877_s1 = sshll.u32 %s1485_s18, 4 }
 0x113   : > { %1966 = vmatprep.subr.bf16.mxu1 %v1965_v43  ;;  %v356_v52 = vld [vmem:[#allocation11 + $0x40] sm:$0xff]  ;;  %v358_v53 = vld [vmem:[#allocation11 + $0x50] sm:$0xff]  ;;  %v403_v55 = vld [vmem:[#allocation13 + $0x58] sm:$0xff]  ;;  %v1923_v58 = vpack.c.bf16 %v398_v50, %v396_v45  ;;  %s1488_s13 = scalar_lea.vmem [#allocation2], %s1877_s1  ;;  %p248_p13 = scmp.ge.s32.totalorder %s3318_s19, 3  }
 0x114   : > { %v361_v56 = vld [vmem:[#allocation11 + $0x68] sm:$0xff]  ;;  %v363_v57 = vld [vmem:[#allocation11 + $0x78] sm:$0xff]  ;;  %v400_v59 = vld [vmem:[#allocation13 + $0x40] sm:$0xff]  ;;  %v1971_v61 = vpack.c.bf16 %v358_v53, %v356_v52  ;;  %v1925_v62 = vpack.c.bf16 %v403_v55, %v401_v54 }
 0x115   : > { %286 = vmatpush1.msra.mxu0 %v271_v41  ;;  %v402_v60 = vld [vmem:[#allocation13 + $0x50] sm:$0xff]  ;;  %v405_v63 = vld [vmem:[#allocation13 + $0x68] sm:$0xff]  ;;  %v1973_v8 = vpack.c.bf16 %v363_v57, %v361_v56  ;;  %v360_v9 = vld [vmem:[#allocation11 + $0x60] sm:$0xff]  ;;  %s1529_s28 = scalar_lea.vmem %s3613_s2, %s3116_s7 }
 0x116   : > { %1854 = vmatmul.mubr.msk.f32.vlgmr.msra.gmra.mrb[0].mxu0 %vm273_vm1, %v262_v22  ;;  %1918 = vmatprep.subr.bf16.mxu0 %v1917_v42  ;;  %v362_v10 = vld [vmem:[#allocation11 + $0x70] sm:$0xff]  ;;  %v407_v11 = vld [vmem:[#allocation13 + $0x78] sm:$0xff]  ;;  %v365_v12 = vld [vmem:[#allocation11 + $0x88] sm:$0xff]  ;;  %v1927_v14 = vpack.c.bf16 %v402_v60, %v400_v59 }
 0x117   : > { %1920 = vmatpush1.bf16.msra.mxu0 %v1919_v44  ;;  %1968 = vmatpush1.bf16.msra.mxu1 %v1967_v46  ;;  %v367_v13 = vld [vmem:[#allocation11 + $0x98] sm:$0xff]  ;;  %v404_v16 = vld [vmem:[#allocation13 + $0x60] sm:$0xff]  ;;  %v406_v17 = vld [vmem:[#allocation13 + $0x70] sm:$0xff]  ;;  %v1975_v18 = vpack.c.bf16 %v362_v10, %v360_v9  ;;  %v1929_v19 = vpack.c.bf16 %v407_v11, %v405_v63  ;;  %s1531_s5 = scalar_lea.vmem %s3615_s6, %s3116_s7 }
 0x118   : > { %1922 = vmatprep.subr.bf16.mxu0 %v1921_v49  ;;  %1970 = vmatprep.subr.bf16.mxu1 %v1969_v51  ;;  %v409_v20 = vld [vmem:[#allocation13 + $0x88] sm:$0xff]  ;;  %v1977_v21 = vpack.c.bf16 %v367_v13, %v365_v12  ;;  %v364_v22 = vld [vmem:[#allocation11 + $0x80] sm:$0xff]  ;;  %v366_v23 = vld [vmem:[#allocation11 + $0x90] sm:$0xff]  ;;  %v1931_v27 = vpack.c.bf16 %v406_v17, %v404_v16 }
 0x119   : > { %v411_v24 = vld [vmem:[#allocation13 + $0x98] sm:$0xff]  ;;  %v369_v25 = vld [vmem:[#allocation11 + $0xa8] sm:$0xff]  ;;  %v408_v28 = vld [vmem:[#allocation13 + $0x80] sm:$0xff]  ;;  %v1979_v30 = vpack.c.bf16 %v366_v23, %v364_v22  ;;  %1855 = vmatprep.mubr.msk.f32.mxu0 %vm436_vm2, %v2718_v1 }
 0x11a   : > { %v371_v26 = vld [vmem:[#allocation11 + $0xb8] sm:$0xff]  ;;  %v410_v29 = vld [vmem:[#allocation13 + $0x90] sm:$0xff]  ;;  %v1933_v31 = vpack.c.bf16 %v411_v24, %v409_v20  ;;  %v413_v32 = vld [vmem:[#allocation13 + $0xa8] sm:$0xff] }
 0x11b   : > { %1924 = vmatpush1.bf16.msra.mxu0 %v1923_v58  ;;  %1972 = vmatpush1.bf16.msra.mxu1 %v1971_v61  ;;  %v1981_v34 = vpack.c.bf16 %v371_v26, %v369_v25  ;;  %v368_v35 = vld [vmem:[#allocation11 + $0xa0] sm:$0xff]  ;;  %v370_v36 = vld [vmem:[#allocation11 + $0xb0] sm:$0xff]  ;;  %v415_v37 = vld [vmem:[#allocation13 + $0xb8] sm:$0xff]  ;;  %v1935_v40 = vpack.c.bf16 %v410_v29, %v408_v28 }
 0x11c   : > { %1926 = vmatprep.subr.bf16.mxu0 %v1925_v62  ;;  %1974 = vmatprep.subr.bf16.mxu1 %v1973_v8  ;;  %v373_v38 = vld [vmem:[#allocation11 + $0xc8] sm:$0xff]  ;;  %v375_v39 = vld [vmem:[#allocation11 + $0xd8] sm:$0xff]  ;;  %v412_v41 = vld [vmem:[#allocation13 + $0xa0] sm:$0xff]  ;;  %v1983_v43 = vpack.c.bf16 %v370_v36, %v368_v35  ;;  %v1937_v44 = vpack.c.bf16 %v415_v37, %v413_v32 }
 0x11d   : > { %v414_v42 = vld [vmem:[#allocation13 + $0xb0] sm:$0xff]  ;;  %v417_v45 = vld [vmem:[#allocation13 + $0xc8] sm:$0xff]  ;;  %v1985_v46 = vpack.c.bf16 %v375_v39, %v373_v38  ;;  %v372_v47 = vld [vmem:[#allocation11 + $0xc0] sm:$0xff] }
 0x11e   : > { %v374_v48 = vld [vmem:[#allocation11 + $0xd0] sm:$0xff]  ;;  %v419_v49 = vld [vmem:[#allocation13 + $0xd8] sm:$0xff]  ;;  %v377_v50 = vld [vmem:[#allocation11 + $0xe8] sm:$0xff]  ;;  %v1939_v52 = vpack.c.bf16 %v414_v42, %v412_v41 }
 0x11f   : > { %1928 = vmatpush1.bf16.msra.mxu0 %v1927_v14  ;;  %1976 = vmatpush1.bf16.msra.mxu1 %v1975_v18  ;;  %v379_v51 = vld [vmem:[#allocation11 + $0xf8] sm:$0xff]  ;;  %v416_v53 = vld [vmem:[#allocation13 + $0xc0] sm:$0xff]  ;;  %v418_v54 = vld [vmem:[#allocation13 + $0xd0] sm:$0xff]  ;;  %v1987_v55 = vpack.c.bf16 %v374_v48, %v372_v47  ;;  %v1941_v56 = vpack.c.bf16 %v419_v49, %v417_v45 }
 0x120   : > { %1930 = vmatprep.subr.bf16.mxu0 %v1929_v19  ;;  %1978 = vmatprep.subr.bf16.mxu1 %v1977_v21  ;;  %v421_v57 = vld [vmem:[#allocation13 + $0xe8] sm:$0xff]  ;;  %v1989_v58 = vpack.c.bf16 %v379_v51, %v377_v50  ;;  %v376_v59 = vld [vmem:[#allocation11 + $0xe0] sm:$0xff]  ;;  %v378_v60 = vld [vmem:[#allocation11 + $0xf0] sm:$0xff]  ;;  %v1943_v8 = vpack.c.bf16 %v418_v54, %v416_v53  ;;  %v2753_v53 = vmov 0.0|0.0  }
 0x121   : > { %v423_v61 = vld [vmem:[#allocation13 + $0xf8] sm:$0xff]  ;;  %v381_v62 = vld [vmem:[#allocation11 + $0x108] sm:$0xff]  ;;  %v420_v9 = vld [vmem:[#allocation13 + $0xe0] sm:$0xff]  ;;  %v1991_v11 = vpack.c.bf16 %v378_v60, %v376_v59 }
 0x122   : > { %v383_v63 = vld [vmem:[#allocation11 + $0x118] sm:$0xff]  ;;  %v422_v10 = vld [vmem:[#allocation13 + $0xf0] sm:$0xff]  ;;  %v1945_v12 = vpack.c.bf16 %v423_v61, %v421_v57  ;;  %v425_v13 = vld [vmem:[#allocation13 + $0x108] sm:$0xff] }
 0x123   : > { %1932 = vmatpush1.bf16.msra.mxu0 %v1931_v27  ;;  %1980 = vmatpush1.bf16.msra.mxu1 %v1979_v30  ;;  %v1993_v14 = vpack.c.bf16 %v383_v63, %v381_v62  ;;  %v380_v16 = vld [vmem:[#allocation11 + $0x100] sm:$0xff]  ;;  %v382_v17 = vld [vmem:[#allocation11 + $0x110] sm:$0xff]  ;;  %v427_v18 = vld [vmem:[#allocation13 + $0x118] sm:$0xff]  ;;  %v1947_v21 = vpack.c.bf16 %v422_v10, %v420_v9 }
 0x124   : > { %1934 = vmatprep.subr.bf16.mxu0 %v1933_v31  ;;  %1982 = vmatprep.subr.bf16.mxu1 %v1981_v34  ;;  %v385_v19 = vld [vmem:[#allocation11 + $0x128] sm:$0xff]  ;;  %v387_v20 = vld [vmem:[#allocation11 + $0x138] sm:$0xff]  ;;  %v424_v22 = vld [vmem:[#allocation13 + $0x100] sm:$0xff]  ;;  %v1995_v24 = vpack.c.bf16 %v382_v17, %v380_v16  ;;  %v1949_v25 = vpack.c.bf16 %v427_v18, %v425_v13 }
 0x125   : > { %v426_v23 = vld [vmem:[#allocation13 + $0x110] sm:$0xff]  ;;  %v429_v26 = vld [vmem:[#allocation13 + $0x128] sm:$0xff]  ;;  %v1997_v27 = vpack.c.bf16 %v387_v20, %v385_v19  ;;  %v384_v28 = vld [vmem:[#allocation11 + $0x120] sm:$0xff] }
 0x126   : > { %v386_v29 = vld [vmem:[#allocation11 + $0x130] sm:$0xff]  ;;  %v431_v30 = vld [vmem:[#allocation13 + $0x138] sm:$0xff]  ;;  %v389_v31 = vld [vmem:[#allocation11 + $0x148] sm:$0xff]  ;;  %v1951_v34 = vpack.c.bf16 %v426_v23, %v424_v22 }
 0x127   : > { %1936 = vmatpush1.bf16.msra.mxu0 %v1935_v40  ;;  %1984 = vmatpush1.bf16.msra.mxu1 %v1983_v43  ;;  %v391_v32 = vld [vmem:[#allocation11 + $0x158] sm:$0xff]  ;;  %v1999_v35 = vpack.c.bf16 %v386_v29, %v384_v28  ;;  %v1953_v36 = vpack.c.bf16 %v431_v30, %v429_v26  ;;  %v428_v37 = vld [vmem:[#allocation13 + $0x120] sm:$0xff]  ;;  %v430_v38 = vld [vmem:[#allocation13 + $0x130] sm:$0xff] }
 0x128   : > { %1938 = vmatprep.subr.bf16.mxu0 %v1937_v44  ;;  %1986 = vmatprep.subr.bf16.mxu1 %v1985_v46  ;;  %v2001_v39 = vpack.c.bf16 %v391_v32, %v389_v31  ;;  %v433_v40 = vld [vmem:[#allocation13 + $0x148] sm:$0xff]  ;;  %v435_v41 = vld [vmem:[#allocation13 + $0x158] sm:$0xff]  ;;  %v1955_v42 = vpack.c.bf16 %v430_v38, %v428_v37  ;;  %v432_v44 = vld [vmem:[#allocation13 + $0x140] sm:$0xff]  ;;  %v587_v38 = vlaneseq }
 0x129   : > { %v1957_v43 = vpack.c.bf16 %v435_v41, %v433_v40  ;;  %v434_v45 = vld [vmem:[#allocation13 + $0x150] sm:$0xff]  ;;  %v388_v47 = vld [vmem:[#allocation11 + $0x140] sm:$0xff]  ;;  %v622_v51 = vld [vmem:[#allocation16 + $0x8] sm:$0xff] }
 0x12a   : > { %v1959_v46 = vpack.c.bf16 %v434_v45, %v432_v44  ;;  %v390_v48 = vld [vmem:[#allocation11 + $0x150] sm:$0xff]  ;;  %v602_v59 = vld [vmem:[#allocation14 + $0x18] sm:$0xff]  ;;  %v603_v7 = vld [vmem:[#allocation14 + $0x20] sm:$0xff]  ;;  %v3147_v41 = vshrl.u32 %v587_v38, 7 }
 0x12b   : > { %1940 = vmatpush1.bf16.msra.mxu0 %v1939_v52  ;;  %1988 = vmatpush1.bf16.msra.mxu1 %v1987_v55  ;;  %v2003_v49 = vpack.c.bf16 %v390_v48, %v388_v47  ;;  %v621_v50 = vld [vmem:[#allocation16] sm:$0xff]  ;;  %v623_v52 = vld [vmem:[#allocation16 + $0x10] sm:$0xff]  ;;  %v624_v55 = vld [vmem:[#allocation16 + $0x18] sm:$0xff] }
 0x12c   : > { %1942 = vmatprep.subr.bf16.mxu0 %v1941_v56  ;;  %1990 = vmatprep.subr.bf16.mxu1 %v1989_v58  ;;  %v2006_v54 = vpack.c.bf16 %v622_v51, %v621_v50  ;;  %v2009_v1 = vpack.c.bf16 %v624_v55, %v623_v52  ;;  %v600_v56 = vld [vmem:[#allocation14 + $0x8] sm:$0xff]  ;;  %v601_v58 = vld [vmem:[#allocation14 + $0x10] sm:$0xff]  ;;  %v606_v9 = vld [vmem:[#allocation14 + $0x38] sm:$0xff]  ;;  %v3156_v44 = vsub.s32 0, %v3147_v41  ;;  %vm1770_vm13 = vcmp.eq.s32.totalorder (%p248_p13), %v3147_v41, 0 }
 0x12d   : > { %v2015_v61 = vpack.c.bf16 %v602_v59, %v601_v58  ;;  %v604_v62 = vld [vmem:[#allocation14 + $0x28] sm:$0xff]  ;;  %v607_v13 = vld [vmem:[#allocation14 + $0x40] sm:$0xff]  ;;  %v609_v17 = vld [vmem:[#allocation14 + $0x50] sm:$0xff] }
 0x12e   : > { %v2018_v63 = vpack.c.bf16 %v604_v62, %v603_v7  ;;  %v610_v18 = vld [vmem:[#allocation14 + $0x58] sm:$0xff]  ;;  %v611_v20 = vld [vmem:[#allocation14 + $0x60] sm:$0xff]  ;;  %v613_v23 = vld [vmem:[#allocation14 + $0x70] sm:$0xff] }
 0x12f   : > { %1944 = vmatpush1.bf16.msra.mxu0 %v1943_v8  ;;  %1992 = vmatpush1.bf16.msra.mxu1 %v1991_v11  ;;  %v605_v8 = vld [vmem:[#allocation14 + $0x30] sm:$0xff]  ;;  %v2027_v19 = vpack.c.bf16 %v610_v18, %v609_v17  ;;  %v615_v26 = vld [vmem:[#allocation14 + $0x80] sm:$0xff]  ;;  %v618_v30 = vld [vmem:[#allocation14 + $0x98] sm:$0xff] }
 0x130   : > { %1946 = vmatprep.subr.bf16.mxu0 %v1945_v12  ;;  %1994 = vmatprep.subr.bf16.mxu1 %v1993_v14  ;;  %v2021_v12 = vpack.c.bf16 %v606_v9, %v605_v8  ;;  %v608_v14 = vld [vmem:[#allocation14 + $0x48] sm:$0xff]  ;;  %v617_v29 = vld [vmem:[#allocation14 + $0x90] sm:$0xff]  ;;  %v1859_v55 = vld [vmem:[%s3568_s14] ss:$0 sm:$0xff] }
 0x131   : > { %v2024_v16 = vpack.c.bf16 %v608_v14, %v607_v13  ;;  %v2039_v31 = vpack.c.bf16 %v618_v30, %v617_v29  ;;  %v807_v9 = vld [vmem:[#allocation17 + $0x8] sm:$0xff]  ;;  %v808_v13 = vld [vmem:[#allocation17 + $0x10] sm:$0xff] }
 0x132   : > { %v811_v14 = vld [vmem:[#allocation17 + $0x28] sm:$0xff] }
 0x133   : > { %1948 = vmatpush1.bf16.msra.mxu0 %v1947_v21  ;;  %1996 = vmatpush1.bf16.msra.mxu1 %v1995_v24  ;;  %v612_v21 = vld [vmem:[#allocation14 + $0x68] sm:$0xff]  ;;  %v614_v24 = vld [vmem:[#allocation14 + $0x78] sm:$0xff] }
 0x134   : > { %1950 = vmatprep.subr.bf16.mxu0 %v1949_v25  ;;  %1998 = vmatprep.subr.bf16.mxu1 %v1997_v27  ;;  %v2030_v22 = vpack.c.bf16 %v612_v21, %v611_v20  ;;  %v2033_v25 = vpack.c.bf16 %v614_v24, %v613_v23  ;;  %v616_v27 = vld [vmem:[#allocation14 + $0x88] sm:$0xff]  ;;  %v812_v20 = vld [vmem:[#allocation17 + $0x30] sm:$0xff] }
 0x135   : > { %v2036_v28 = vpack.c.bf16 %v616_v27, %v615_v26  ;;  %v902_v24 = vld [vmem:[%s3610_s9] sm:$0xff]  ;;  %v904_v27 = vld [vmem:[%s3610_s9 + $0x10] sm:$0xff] }
 0x137   : > { %1952 = vmatpush1.bf16.msra.mxu0 %v1951_v34  ;;  %2000 = vmatpush1.bf16.msra.mxu1 %v1999_v35  ;;  %v619_v35 = vld [vmem:[#allocation14 + $0xa0] sm:$0xff] }
 0x138   : > { %1954 = vmatprep.subr.bf16.mxu0 %v1953_v36  ;;  %2002 = vmatprep.subr.bf16.mxu1 %v2001_v39  ;;  %v620_v36 = vld [vmem:[#allocation14 + $0xa8] sm:$0xff] }
 0x139   : > { %v2042_v37 = vpack.c.bf16 %v620_v36, %v619_v35  ;;  %v908_v35 = vld [vmem:[%s3610_s9 + $0x30] sm:$0xff]  ;;  %v909_v36 = vld [vmem:[%s3610_s9 + $0x38] sm:$0xff] }
 0x13b   : > { %1956 = vmatpush1.bf16.msra.mxu0 %v1955_v42  ;;  %2004 = vmatpush1.bf16.msra.mxu1 %v2003_v49  ;;  %v3150_v42 = vsub.s32 1, %v3147_v41 }
 0x13c   : > { %1958 = vmatprep.subr.bf16.mxu0 %v1957_v43  ;;  %v585_v43 = vld [vmem:[%s3565_s11] sm:$0x3]  ;;  %s2758_s11 = smov (%p248_p13), [#allocation22]  }
 0x13d   : > { %v590_v48 = vrot.slane %v585_v43, %v3156_v44  ;;  %s1797_s14 = sshll.u32 (%p248_p13), %s2758_s11, 4  ;;  %s1798_s14 = int_to_ptr.vmem [resolvable:$true] %s1797_s14 }
 0x13e   :  { %p2631_p1 = scmp.lt.s32.totalorder (%p248_p13), %s1798_s14, %s1798_s14 }
 0x13f   : > { %1960 = vmatpush1.bf16.msra.mxu0 %v1959_v46  ;;  %v594_v46 = vrot.slane %v585_v43, %v3150_v42 }
 0x140   : > { %2005 = vmatprep.subr.bf16.mxu0 %v2753_v53 }
 0x142   : > { %505 = vmatmul.mubr.f32.vlgmr.msra.gmra.mrb[2].mxu0 %v2722_v0  ;;  %v599_v0 = vld [vmem:[#allocation14] sm:$0xff] }
 0x143   : > { %1895 = vmatprep.mubr.msk.f32.mxu0 %vm2754_vm3, %v2752_v15  ;;  %2007 = vmatpush3.bf16.msra.mxu0 %v2006_v54  ;;  %v2012_v57 = vpack.c.bf16 %v600_v56, %v599_v0 }
 0x144   : > { %2008 = vmatprep.subr.bf16.mxu0 %v2753_v53 }
 0x147   : > { %2010 = vmatpush3.bf16.msra.mxu0 %v2009_v1 }
 0x148   : > { %2011 = vmatprep.subr.bf16.mxu0 %v2753_v53 }
 0x17e   : > { %v627_v60 = vpop.permute.xlu0 %626 }
 0x17f   : > { %1896 = vmatmul.mubr.msk.f32.vlgmr.msra.gmra.mrb[4].mxu0 %vm628_vm4, %v627_v60 }
 0x180   : > { %2013 = vmatpush1.bf16.msra.mxu0 %v2012_v57 }
 0x181   : > { %2014 = vmatprep.subr.bf16.mxu0 %v2753_v53 }
 0x184   : > { %2016 = vmatpush1.bf16.msra.mxu0 %v2015_v61 }
 0x185   : > { %2017 = vmatprep.subr.bf16.mxu0 %v2753_v53 }
 0x188   : > { %2019 = vmatpush1.bf16.msra.mxu0 %v2018_v63 }
 0x189   : > { %2020 = vmatprep.subr.bf16.mxu0 %v2753_v53 }
 0x18c   : > { %2022 = vmatpush1.bf16.msra.mxu0 %v2021_v12 }
 0x18d   : > { %2023 = vmatprep.subr.bf16.mxu0 %v2753_v53 }
 0x190   : > { %2025 = vmatpush1.bf16.msra.mxu0 %v2024_v16  ;;  %v813_v16 = vld [vmem:[#allocation17 + $0x38] sm:$0xff] }
 0x191   : > { %2026 = vmatprep.subr.bf16.mxu0 %v2753_v53  ;;  %v2048_v18 = vpack.c.bf16 %v813_v16, %v811_v14  ;;  %v1162_v14 = vld [vmem:[#allocation19 + $0x10] sm:$0xff]  ;;  %v1165_v16 = vld [vmem:[#allocation19 + $0x28] sm:$0xff] }
 0x194   : > { %2028 = vmatpush1.bf16.msra.mxu0 %v2027_v19  ;;  %v810_v19 = vld [vmem:[#allocation17 + $0x20] sm:$0xff] }
 0x195   : > { %2029 = vmatprep.subr.bf16.mxu0 %v2753_v53  ;;  %v2050_v21 = vpack.c.bf16 %v812_v20, %v810_v19  ;;  %v1164_v19 = vld [vmem:[#allocation19 + $0x20] sm:$0xff]  ;;  %v1166_v20 = vld [vmem:[#allocation19 + $0x30] sm:$0xff] }
 0x198   : > { %2031 = vmatpush1.bf16.msra.mxu0 %v2030_v22 }
 0x199   : > { %2032 = vmatprep.subr.bf16.mxu0 %v2753_v53 }
 0x19c   : > { %2034 = vmatpush1.bf16.msra.mxu0 %v2033_v25  ;;  %v903_v25 = vld [vmem:[%s3610_s9 + $0x8] sm:$0xff] }
 0x19d   : > { %2035 = vmatprep.subr.bf16.mxu0 %v2753_v53  ;;  %v2053_v26 = vpack.c.bf16 %v903_v25, %v902_v24  ;;  %v2095_v24 = vpack.c.bf16 %v1166_v20, %v1164_v19  ;;  %v1009_v19 = vld [vmem:[#allocation10 + $0x20] sm:$0xff]  ;;  %v3273_v20 = vld [vmem:[%s1003_s10] sm:$0xff] }
 0x1a0   : > { %2037 = vmatpush1.bf16.msra.mxu0 %v2036_v28  ;;  %v905_v28 = vld [vmem:[%s3610_s9 + $0x18] sm:$0xff] }
 0x1a1   : > { %2038 = vmatprep.subr.bf16.mxu0 %v2753_v53  ;;  %v2056_v30 = vpack.c.bf16 %v905_v28, %v904_v27  ;;  %v1170_v27 = vld [vmem:[#allocation19 + $0x50] sm:$0xff]  ;;  %v1173_v28 = vld [vmem:[#allocation19 + $0x68] sm:$0xff] }
 0x1a4   : > { %2040 = vmatpush1.bf16.msra.mxu0 %v2039_v31  ;;  %v906_v31 = vld [vmem:[%s3610_s9 + $0x20] sm:$0xff] }
 0x1a5   : > { %2041 = vmatprep.subr.bf16.mxu0 %v2753_v53 }
 0x1a8   : > { %2043 = vmatpush1.bf16.msra.mxu0 %v2042_v37  ;;  %v2062_v37 = vpack.c.bf16 %v909_v36, %v908_v35  ;;  %v1177_v35 = vld [vmem:[#allocation19 + $0x88] sm:$0xff]  ;;  %v1179_v36 = vld [vmem:[#allocation19 + $0x98] sm:$0xff] }
 0x1e9   : > { %v343_v10 = vpop.f32.mrb[0].mxu0 }
 0x1ea   : > { %v345_v11 = vpop.f32.mrb[1].mxu0 }
 0x1eb   : > { %1856 = vmatprep.mubr.msk.f32.mxu1 %vm436_vm2, %v345_v11  ;;  %v806_v11 = vld [vmem:[#allocation17] sm:$0xff] }
 0x1ec   : > { %579 = vmatmul.mubr.f32.vlgmr.msra.gmra.mrb[0].mxu1 %v343_v10  ;;  %v809_v10 = vld [vmem:[#allocation17 + $0x18] sm:$0xff]  ;;  %v2046_v17 = vpack.c.bf16 %v808_v13, %v806_v11  ;;  %v2757_v11 = vmov 0  }
 0x1ed   : > { %v2044_v12 = vpack.c.bf16 %v809_v10, %v807_v9  ;;  %v1161_v9 = vld [vmem:[#allocation19 + $0x8] sm:$0xff]  ;;  %v1160_v10 = vld [vmem:[#allocation19] sm:$0xff]  ;;  %2330 = vset.pattern.permute.xlu1 %v2757_v11 }
 0x1ef   : > { %2045 = vmatprep.subr.bf16.mxu0 %v2044_v12  ;;  %v1528_v12 = vld [vmem:[%s1527_s0] sm:$0xff] }
 0x215   : > { %v506_v32 = vpop.f32.mrb[2].mxu0 }
 0x216   : > { %v508_v34 = vpop.f32.mrb[3].mxu0 }
 0x252   : > { %v697_v39 = vpop.f32.mrb[4].mxu0 }
 0x253   : > { %v1897_v40 = vpop.f32.mrb[5].mxu0 }
 0x254   : > { %v911_v40 = vld [vmem:[%s3610_s9 + $0x48] sm:$0xff] }
 0x2bf   : > { %v580_v45 = vpop.f32.mrb[0].mxu1 }
 0x2c0   : > { %v581_v47 = vadd.f32 %v580_v45, %v506_v32  ;;  %v582_v49 = vpop.f32.mrb[1].mxu1  ;;  %v907_v32 = vld [vmem:[%s3610_s9 + $0x28] sm:$0xff]  ;;  %v912_v45 = vld [vmem:[%s3610_s9 + $0x50] sm:$0xff] }
 0x2c1   : > { %v583_v50 = vadd.f32 %v582_v49, %v508_v34  ;;  %v2059_v34 = vpack.c.bf16 %v907_v32, %v906_v31  ;;  %v915_v49 = vld [vmem:[%s3610_s9 + $0x68] sm:$0xff]  ;;  %v1172_v32 = vld [vmem:[#allocation19 + $0x60] sm:$0xff] }
 0x2c2   : > { %v597_v52 = vadd.f32 %v590_v48, %v581_v47  ;;  %v914_v48 = vld [vmem:[%s3610_s9 + $0x60] sm:$0xff] }
 0x2c3   : > { %v598_v51 = vadd.f32 %v594_v46, %v583_v50  ;;  %v913_v46 = vld [vmem:[%s3610_s9 + $0x58] sm:$0xff]  ;;  %v2071_v50 = vpack.c.bf16 %v915_v49, %v914_v48  ;;  %v1180_v49 = vld [vmem:[#allocation19 + $0xa0] sm:$0xff] }
 0x2c4   : > { %v2068_v47 = vpack.c.bf16 %v913_v46, %v912_v45  ;;  %v1181_v45 = vld [vmem:[#allocation19 + $0xa8] sm:$0xff]  ;;  %v1183_v46 = vld [vmem:[#allocation19 + $0xb8] sm:$0xff] }
 0x2c5   : > { %1858 = vmatprep.mubr.msk.f32.mxu0 %vm436_vm2, %v598_v51  ;;  %v916_v51 = vld [vmem:[%s3610_s9 + $0x70] sm:$0xff]  ;;  %v2109_v48 = vpack.c.bf16 %v1183_v46, %v1181_v45  ;;  %v1117_v45 = vld [vmem:[%s3571_s17 + $0x18] sm:$0xff] }
 0x2c6   : > { %769 = vmatmul.mubr.f32.vlgmr.msra.gmra.mrb[6].mxu0 %v597_v52  ;;  %v917_v52 = vld [vmem:[%s3610_s9 + $0x78] sm:$0xff] }
 0x2c7   : > { %895 = vmatprep.mubr.f32.mxu0 %v2752_v15  ;;  %2047 = vmatpush1.bf16.msra.mxu0 %v2046_v17  ;;  %v2091_v17 = vpack.c.bf16 %v1162_v14, %v1160_v10  ;;  %v1007_v10 = vld [vmem:[#allocation10 + $0x10] sm:$0xff] }
 0x2c8   : > { %2049 = vmatprep.subr.bf16.mxu0 %v2048_v18  ;;  %v1167_v18 = vld [vmem:[#allocation19 + $0x38] sm:$0xff] }
 0x2cb   : > { %2051 = vmatpush1.bf16.msra.mxu0 %v2050_v21  ;;  %v2093_v21 = vpack.c.bf16 %v1167_v18, %v1165_v16  ;;  %v1010_v18 = vld [vmem:[#allocation10 + $0x28] sm:$0xff] }
 0x2cc   : > { %2052 = vmatprep.subr.bf16.mxu0 %v2753_v53 }
 0x399   : > { %v770_v54 = vpop.f32.mrb[6].mxu0 }
 0x39a   : > { %v771_v1 = vadd.f32 %v770_v54, %v697_v39  ;;  %v772_v0 = vpop.f32.mrb[7].mxu0  ;;  %v910_v39 = vld [vmem:[%s3610_s9 + $0x40] sm:$0xff]  ;;  %v2074_v54 = vpack.c.bf16 %v917_v52, %v916_v51  ;;  %v1185_v51 = vld [vmem:[#allocation19 + $0xc8] sm:$0xff]  ;;  %v1187_v52 = vld [vmem:[#allocation19 + $0xd8] sm:$0xff] }
 0x39b   : > { %v2065_v43 = vpack.c.bf16 %v911_v40, %v910_v39  ;;  %v2105_v39 = vpack.c.bf16 %v1179_v36, %v1177_v35  ;;  %v1176_v40 = vld [vmem:[#allocation19 + $0x80] sm:$0xff]  ;;  %v1203_v35 = vld [vmem:[#allocation19 + $0x158] sm:$0xff] }
 0x39c   : > { %v781_v56 = vadd.f32 %v1859_v55, %v771_v1  ;;  %v918_v55 = vld [vmem:[%s3610_s9 + $0x80] sm:$0xff]  ;;  %v919_v1 = vld [vmem:[%s3610_s9 + $0x88] sm:$0xff] }
 0x39d   : > { %v2077_v0 = vpack.c.bf16 %v919_v1, %v918_v55  ;;  %v2113_v55 = vpack.c.bf16 %v1187_v52, %v1185_v51  ;;  %v1184_v1 = vld [vmem:[#allocation19 + $0xc0] sm:$0xff]  ;;  %v1100_v52 = vld [vmem:[%s3576_s22] sm:$0x3] }
 0x39e   : > { %2332 = vtanh.f32 %v781_v56  ;;  %v1860_v58 = vmul.f32 -1.442695, %v781_v56  ;;  %v920_v56 = vld [vmem:[%s3610_s9 + $0x90] sm:$0xff] }
 0x3a0   : > { %2334 = vpow2.f32 %v1860_v58 }
 0x3a8   : > { %v2333_v57 = vpop.eup %2332 }
 0x3a9   : > { %791 = vrot.lane.b32.xlu0 %v2333_v57, %s2756_s23  ;;  %v921_v57 = vld [vmem:[%s3610_s9 + $0x98] sm:$0xff] }
 0x3aa   : > { %v2335_v59 = vpop.eup %2334  ;;  %v2080_v58 = vpack.c.bf16 %v921_v57, %v920_v56  ;;  %v1189_v56 = vld [vmem:[#allocation19 + $0xe8] sm:$0xff]  ;;  %v1191_v57 = vld [vmem:[#allocation19 + $0xf8] sm:$0xff] }
 0x3ab   : > { %v785_v60 = vadd.f32 1.0, %v2335_v59  ;;  %v922_v59 = vld [vmem:[%s3610_s9 + $0xa0] sm:$0xff] }
 0x3ad   : > { %2336 = vrcp.f32 %v785_v60  ;;  %v923_v60 = vld [vmem:[%s3610_s9 + $0xa8] sm:$0xff] }
 0x3b7   : > { %v2337_v61 = vpop.eup %2336 }
 0x3b8   : > { %v789_v63 = vmul.f32 %v2726_v6, %v2337_v61 }
 0x41b   : > { %v792_v7 = vpop.permute.xlu0 %791 }
 0x41c   : > { %v794_v62 = vmul.f32 %v2337_v61, %v792_v7 }
 0x41e   : > { %796 = vrot.lane.b32.xlu1 %v794_v62, %s2756_s23  ;;  %v1006_v62 = vld [vmem:[#allocation10 + $0x8] sm:$0xff] }
 0x490   : > { %v797_v8 = vpop.permute.xlu1 %796 }
 0x491   : > { %v3168_v6 = vadd.f32 %v797_v8, %v789_v63   ;;  %v1008_v63 = vld [vmem:[#allocation10 + $0x18] sm:$0xff] }
 0x492   : > { %v2085_v8 = vpack.c.bf16 %v1008_v63, %v1006_v62  ;;  %v814_v63 = vld [vmem:[%s3570_s16] sm:$0x3]  ;;  %s2626_s16 = scalar_lea.vmem (%p248_p13), %s1798_s14, 128 }
 0x493   : > { %2338 = vtanh.f32 %v3168_v6  ;;  %p2627_p0 = scmp.ne.s32.totalorder (%p248_p13), %s1798_s14, %s2626_s16  ;;  %p2632_p2 = scmp.lt.s32.totalorder (%p248_p13), %s2626_s16, %s2626_s16 }
 0x495   :  { %p2633_p3 = por (%p248_p13), %p2632_p2, %p2631_p1 }
 0x497   :  { %p2634_p4 = pnand (%p248_p13), %p2633_p3, %p2627_p0 }
 0x49d   : > { %v2339_v22 = vpop.eup %2338 }
 0x49e   : > { %802 = vrot.lane.b32.xlu1 %v2339_v22, %s2756_s23  ;;  %v1169_v22 = vld [vmem:[#allocation19 + $0x48] sm:$0xff] }
 0x4a2   : > { %1578 = vperm.xlu1 %2330, %v1528_v12  }
 0x510   : > { %v803_v23 = vpop.permute.xlu1 %802 }
 0x511   : > { %v3173_v7 = vmul.f32 %v2337_v61, %v803_v23   ;;  %v2083_v61 = vpack.c.bf16 %v923_v60, %v922_v59  ;;  %v1171_v23 = vld [vmem:[#allocation19 + $0x58] sm:$0xff]  ;;  %v2117_v59 = vpack.c.bf16 %v1191_v57, %v1189_v56  ;;  %v1188_v60 = vld [vmem:[#allocation19 + $0xe0] sm:$0xff]  ;;  %v1109_v56 = vrot.slane %v1100_v52, %v3150_v42 }
 0x512   : > { %v2097_v25 = vpack.c.bf16 %v1171_v23, %v1169_v22  ;;  %v1195_v22 = vld [vmem:[#allocation19 + $0x118] sm:$0xff] }
 0x513   : > { %827 = vrot.lane.b32.xlu0 %v3173_v7, %s2755_s15 }
 0x585   : > { %v828_v29 = vpop.permute.xlu0 %827 }
 0x586   : > { %1861 = vmatmul.mubr.msk.f32.vlgmr.msra.gmra.mrb[8].mxu0 %vm628_vm4, %v828_v29  ;;  %v1175_v29 = vld [vmem:[#allocation19 + $0x78] sm:$0xff] }
 0x587   : > { %2054 = vmatpush1.bf16.msra.mxu0 %v2053_v26  ;;  %v1168_v26 = vld [vmem:[#allocation19 + $0x40] sm:$0xff]  ;;  %v2101_v31 = vpack.c.bf16 %v1175_v29, %v1173_v28  ;;  %v1199_v28 = vld [vmem:[#allocation19 + $0x138] sm:$0xff] }
 0x588   : > { %2055 = vmatprep.subr.bf16.mxu0 %v2753_v53 }
 0x58b   : > { %2057 = vmatpush1.bf16.msra.mxu0 %v2056_v30  ;;  %v2099_v30 = vpack.c.bf16 %v1170_v27, %v1168_v26  ;;  %v1197_v27 = vld [vmem:[#allocation19 + $0x128] sm:$0xff] }
 0x58c   : > { %2058 = vmatprep.subr.bf16.mxu0 %v2753_v53  ;;  %v2125_v29 = vpack.c.bf16 %v1199_v28, %v1197_v27  ;;  %v3351_v27 = vld [vmem:[%s1488_s13] sm:$0xff]  ;;  %v3353_v28 = vld [vmem:[%s1488_s13 + $0x8] sm:$0xff] }
 0x58f   : > { %2060 = vmatpush1.bf16.msra.mxu0 %v2059_v34  ;;  %v1174_v34 = vld [vmem:[#allocation19 + $0x70] sm:$0xff] }
 0x590   : > { %2061 = vmatprep.subr.bf16.mxu0 %v2753_v53 }
 0x593   : > { %2063 = vmatpush1.bf16.msra.mxu0 %v2062_v37  ;;  %v2103_v37 = vpack.c.bf16 %v1174_v34, %v1172_v32  ;;  %v1201_v34 = vld [vmem:[#allocation19 + $0x148] sm:$0xff] }
 0x594   : > { %2064 = vmatprep.subr.bf16.mxu0 %v2753_v53  ;;  %v2129_v36 = vpack.c.bf16 %v1203_v35, %v1201_v34  ;;  %v1126_v34 = vld [vmem:[%s3571_s17 + $0x60] sm:$0xff]  ;;  %v1128_v35 = vld [vmem:[%s3571_s17 + $0x70] sm:$0xff] }
 0x597   : > { %2066 = vmatpush1.bf16.msra.mxu0 %v2065_v43  ;;  %v1178_v43 = vld [vmem:[#allocation19 + $0x90] sm:$0xff] }
 0x598   : > { %2067 = vmatprep.subr.bf16.mxu0 %v2753_v53 }
 0x59b   : > { %2069 = vmatpush1.bf16.msra.mxu0 %v2068_v47  ;;  %v2107_v47 = vpack.c.bf16 %v1178_v43, %v1176_v40  ;;  %v1115_v43 = vld [vmem:[%s3571_s17 + $0x8] sm:$0xff] }
 0x59c   : > { %2070 = vmatprep.subr.bf16.mxu0 %v2753_v53  ;;  %v2133_v46 = vpack.c.bf16 %v1117_v45, %v1115_v43  ;;  %v2147_v43 = vpack.c.bf16 %v1128_v35, %v1126_v34  ;;  %v1156_v34 = vld [vmem:[%s3571_s17 + $0x150] sm:$0xff]  ;;  %v1350_v35 = vld [vmem:[#allocation20 + $0x8] sm:$0xff] }
 0x59f   : > { %2072 = vmatpush1.bf16.msra.mxu0 %v2071_v50  ;;  %v1182_v50 = vld [vmem:[#allocation19 + $0xb0] sm:$0xff] }
 0x5a0   : > { %2073 = vmatprep.subr.bf16.mxu0 %v2753_v53 }
 0x5a3   : > { %2075 = vmatpush1.bf16.msra.mxu0 %v2074_v54  ;;  %v2111_v54 = vpack.c.bf16 %v1182_v50, %v1180_v49  ;;  %v1086_v49 = vld [vmem:[%s3575_s21] sm:$0x3] }
 0x5a4   : > { %2076 = vmatprep.subr.bf16.mxu0 %v2753_v53 }
 0x5a7   : > { %2078 = vmatpush1.bf16.msra.mxu0 %v2077_v0  ;;  %v1186_v0 = vld [vmem:[#allocation19 + $0xd0] sm:$0xff] }
 0x5a8   : > { %2079 = vmatprep.subr.bf16.mxu0 %v2753_v53 }
 0x5ab   : > { %2081 = vmatpush1.bf16.msra.mxu0 %v2080_v58  ;;  %v2115_v58 = vpack.c.bf16 %v1186_v0, %v1184_v1  ;;  %v1105_v1 = vrot.slane %v1100_v52, %v3156_v44 }
 0x5ac   : > { %2082 = vmatprep.subr.bf16.mxu0 %v2753_v53  ;;  %v1163_v53 = vld [vmem:[#allocation19 + $0x18] sm:$0xff] }
 0x5ad   : > { %v2089_v13 = vpack.c.bf16 %v1163_v53, %v1161_v9  ;;  %v819_v9 = vrot.slane %v814_v63, %v3156_v44  ;;  %v1005_v53 = vld [vmem:[#allocation10] sm:$0xff] }
 0x5ae   : > { %v2087_v16 = vpack.c.bf16 %v1007_v10, %v1005_v53 }
 0x5af   : > { %2084 = vmatpush1.bf16.msra.mxu0 %v2083_v61  ;;  %2090 = vmatprep.subr.bf16.mxu1 %v2089_v13  ;;  %v1190_v61 = vld [vmem:[#allocation19 + $0xf0] sm:$0xff] }
 0x5b0   : > { %2086 = vmatprep.subr.bf16.mxu0 %v2085_v8  ;;  %2092 = vmatpush1.bf16.msra.mxu1 %v2091_v17  ;;  %v2119_v62 = vpack.c.bf16 %v1190_v61, %v1188_v60  ;;  %v823_v8 = vrot.slane %v814_v63, %v3150_v42  ;;  %v1114_v61 = vld [vmem:[%s3571_s17] sm:$0xff] }
 0x5b1   : > { %2094 = vmatprep.subr.bf16.mxu1 %v2093_v21  ;;  %v1193_v21 = vld [vmem:[#allocation19 + $0x108] sm:$0xff] }
 0x5b2   : > { %v2121_v23 = vpack.c.bf16 %v1195_v22, %v1193_v21  ;;  %v1125_v21 = vld [vmem:[%s3571_s17 + $0x58] sm:$0xff] }
 0x5b4   : > { %2096 = vmatpush1.bf16.msra.mxu1 %v2095_v24  ;;  %v1192_v24 = vld [vmem:[#allocation19 + $0x100] sm:$0xff] }
 0x5b5   : > { %2098 = vmatprep.subr.bf16.mxu1 %v2097_v25  ;;  %v1194_v25 = vld [vmem:[#allocation19 + $0x110] sm:$0xff] }
 0x5b6   : > { %v2123_v26 = vpack.c.bf16 %v1194_v25, %v1192_v24  ;;  %v1122_v24 = vld [vmem:[%s3571_s17 + $0x40] sm:$0xff]  ;;  %v1124_v25 = vld [vmem:[%s3571_s17 + $0x50] sm:$0xff] }
 0x5b8   : > { %2100 = vmatpush1.bf16.msra.mxu1 %v2099_v30  ;;  %v1196_v30 = vld [vmem:[#allocation19 + $0x120] sm:$0xff] }
 0x5b9   : > { %2102 = vmatprep.subr.bf16.mxu1 %v2101_v31  ;;  %v1198_v31 = vld [vmem:[#allocation19 + $0x130] sm:$0xff] }
 0x5ba   : > { %v2127_v32 = vpack.c.bf16 %v1198_v31, %v1196_v30  ;;  %v1497_v30 = vmul.f32 %v3351_v27, %v3351_v27  ;;  %v1498_v31 = vmul.f32 %v3353_v28, %v3353_v28 }
 0x5bc   : > { %2104 = vmatpush1.bf16.msra.mxu1 %v2103_v37  ;;  %v1200_v37 = vld [vmem:[#allocation19 + $0x140] sm:$0xff] }
 0x5bd   : > { %2106 = vmatprep.subr.bf16.mxu1 %v2105_v39  ;;  %v1202_v39 = vld [vmem:[#allocation19 + $0x150] sm:$0xff] }
 0x5be   : > { %v2131_v40 = vpack.c.bf16 %v1202_v39, %v1200_v37  ;;  %v1133_v37 = vld [vmem:[%s3571_s17 + $0x98] sm:$0xff]  ;;  %v1499_v39 = vsel %vm436_vm2, %v1498_v31, 0.0 }
 0x5c0   : > { %2108 = vmatpush1.bf16.msra.mxu1 %v2107_v47  ;;  %v1579_v47 = vpop.permute.xlu1 %1578 }
 0x5c1   : > { %2110 = vmatprep.subr.bf16.mxu1 %v2109_v48 }
 0x5c4   : > { %2112 = vmatpush1.bf16.msra.mxu1 %v2111_v54  ;;  %v1091_v54 = vrot.slane %v1086_v49, %v3156_v44 }
 0x5c5   : > { %2114 = vmatprep.subr.bf16.mxu1 %v2113_v55  ;;  %v1095_v55 = vrot.slane %v1086_v49, %v3150_v42  ;;  %v1135_v49 = vld [vmem:[%s3571_s17 + $0xa8] sm:$0xff] }
 0x5c8   : > { %2116 = vmatpush1.bf16.msra.mxu1 %v2115_v58 }
 0x5c9   : > { %2118 = vmatprep.subr.bf16.mxu1 %v2117_v59 }
 0x5cc   : > { %2120 = vmatpush1.bf16.msra.mxu1 %v2119_v62  ;;  %v1116_v62 = vld [vmem:[%s3571_s17 + $0x10] sm:$0xff] }
 0x5cd   : > { %2122 = vmatprep.subr.bf16.mxu1 %v2121_v23  ;;  %v2135_v10 = vpack.c.bf16 %v1116_v62, %v1114_v61  ;;  %v1143_v61 = vld [vmem:[%s3571_s17 + $0xe8] sm:$0xff]  ;;  %v1145_v62 = vld [vmem:[%s3571_s17 + $0xf8] sm:$0xff] }
 0x5d0   : > { %2124 = vmatpush1.bf16.msra.mxu1 %v2123_v26  ;;  %v1127_v26 = vld [vmem:[%s3571_s17 + $0x68] sm:$0xff] }
 0x5d1   : > { %2126 = vmatprep.subr.bf16.mxu1 %v2125_v29  ;;  %v2143_v29 = vpack.c.bf16 %v1124_v25, %v1122_v24 }
 0x5d4   : > { %2128 = vmatpush1.bf16.msra.mxu1 %v2127_v32 }
 0x5d5   : > { %2130 = vmatprep.subr.bf16.mxu1 %v2129_v36  ;;  %v1131_v36 = vld [vmem:[%s3571_s17 + $0x88] sm:$0xff] }
 0x5d6   : > { %v2149_v45 = vpack.c.bf16 %v1133_v37, %v1131_v36  ;;  %v1352_v36 = vld [vmem:[#allocation20 + $0x18] sm:$0xff] }
 0x5d8   : > { %2132 = vmatpush1.bf16.msra.mxu1 %v2131_v40  ;;  %v1500_v40 = vadd.f32 %v1499_v39, %v1497_v30  ;;  %v1157_v30 = vld [vmem:[%s3571_s17 + $0x158] sm:$0xff]  ;;  %v2177_v39 = vpack.c.bf16 %v1352_v36, %v1350_v35  ;;  %v1379_v35 = vld [vmem:[#allocation20 + $0xf0] sm:$0xff] }
 0x5d9   : > { %2134 = vmatprep.subr.bf16.mxu1 %v2133_v46  ;;  %v1130_v46 = vld [vmem:[%s3571_s17 + $0x80] sm:$0xff]  ;;  %v1382_v36 = vld [vmem:[#allocation20 + $0x108] sm:$0xff] }
 0x5da   : > { %1501 = vadd.xlane.f32.xlu1 %v1500_v40  ;;  %v1349_v40 = vld [vmem:[#allocation20] sm:$0xff] }
 0x659   : > { %v897_v12 = vpop.f32.mrb[8].mxu0 }
 0x65a   : > { %v899_v13 = vpop.f32.mrb[9].mxu0  ;;  %v3266_v17 = vadd.f32 %v897_v12, %v819_v9  ;;  %v1121_v9 = vld [vmem:[%s3571_s17 + $0x38] sm:$0xff] }
 0x65b   : > { %v3264_v14 = vadd.f32 %v899_v13, %v823_v8  ;;  %v1119_v8 = vld [vmem:[%s3571_s17 + $0x28] sm:$0xff] }
 0x65c   : > { %v2137_v13 = vpack.c.bf16 %v1121_v9, %v1119_v8  ;;  %v2161_v9 = vpack.c.bf16 %v1145_v62, %v1143_v61  ;;  %v1361_v62 = vld [vmem:[#allocation20 + $0x60] sm:$0xff] }
 0x65d   : > { %1862 = vmatprep.mubr.msk.f32.mxu0 %vm436_vm2, %v3264_v14 }
 0x65e   : > { %992 = vmatmul.mubr.f32.vlgmr.msra.gmra.mrb[10].mxu0 %v3266_v17 }
 0x65f   : > { %2088 = vmatpush1.bf16.msra.mxu0 %v2087_v16  ;;  %1079 = vmatprep.mubr.f32.mxu0 %v2752_v15  ;;  %v1118_v16 = vld [vmem:[%s3571_s17 + $0x20] sm:$0xff] }
 0x660   : > { %1019 = vmatprep.subr.mxu0 %v1010_v18  ;;  %v1120_v18 = vld [vmem:[%s3571_s17 + $0x30] sm:$0xff] }
 0x661   : > { %v2139_v22 = vpack.c.bf16 %v1120_v18, %v1118_v16 }
 0x663   : > { %1020 = vmatpush1.msra.mxu0 %v1009_v19  ;;  %v1123_v19 = vld [vmem:[%s3571_s17 + $0x48] sm:$0xff] }
 0x664   : > { %1864 = vmatmul.mubr.msk.f32.vlgmr.msra.gmra.mrb[12].mxu0 %vm1011_vm5, %v3273_v20  ;;  %1898 = vmatprep.subr.mxu0 %v2752_v15  ;;  %v2141_v23 = vpack.c.bf16 %v1125_v21, %v1123_v19  ;;  %v1146_v19 = vld [vmem:[%s3571_s17 + $0x100] sm:$0xff]  ;;  %v1148_v21 = vld [vmem:[%s3571_s17 + $0x110] sm:$0xff] }
 0x665   : > { %1900 = vmatprep.mubr.msk.f32.mxu0 %vm2754_vm3, %v2752_v15  ;;  %v2167_v24 = vpack.c.bf16 %v1148_v21, %v1146_v19  ;;  %v1369_v21 = vld [vmem:[#allocation20 + $0xa0] sm:$0xff] }
 0x731   : > { %v3286_v48 = vpop.f32.mrb[10].mxu0 }
 0x732   : > { %v1581_v50 = vmul.f32 %v1579_v47, %v3286_v48  ;;  %v995_v51 = vpop.f32.mrb[11].mxu0  ;;  %v1132_v47 = vld [vmem:[%s3571_s17 + $0x90] sm:$0xff] }
 0x733   : > { %v2151_v51 = vpack.c.bf16 %v1132_v47, %v1130_v46  ;;  %v1356_v46 = vld [vmem:[#allocation20 + $0x38] sm:$0xff] }
 0x734   : > { %1582 = vxpose.xlu0.b32.start.end [1/1] (short) (narrow) %v1581_v50, 24  ;;  %1899 = vmatpush3.msra.mxu0 %v1581_v50  ;;  %v1137_v50 = vld [vmem:[%s3571_s17 + $0xb8] sm:$0xff] }
 0x735   : > { %v2153_v52 = vpack.c.bf16 %v1137_v50, %v1135_v49  ;;  %v1353_v50 = vld [vmem:[#allocation20 + $0x20] sm:$0xff] }
 0x737   : > { %v1081_v0 = vpop.f32.mrb[12].mxu0 }
 0x738   : > { %v1098_v57 = vmul.f32 %v1091_v54, %v1081_v0  ;;  %v1083_v58 = vpop.f32.mrb[13].mxu0  ;;  %v1134_v54 = vld [vmem:[%s3571_s17 + $0xa0] sm:$0xff]  ;;  %v1141_v0 = vld [vmem:[%s3571_s17 + $0xd8] sm:$0xff] }
 0x739   : > { %v1099_v59 = vmul.f32 %v1095_v55, %v1083_v58  ;;  %v1136_v55 = vld [vmem:[%s3571_s17 + $0xb0] sm:$0xff]  ;;  %v1138_v58 = vld [vmem:[%s3571_s17 + $0xc0] sm:$0xff] }
 0x73a   : > { %v3299_v60 = vadd.f32 %v1105_v1, %v1098_v57  ;;  %v1139_v1 = vld [vmem:[%s3571_s17 + $0xc8] sm:$0xff] }
 0x73b   : > { %v3307_v63 = vadd.f32 %v1109_v56, %v1099_v59  ;;  %v2155_v56 = vpack.c.bf16 %v1136_v55, %v1134_v54  ;;  %v2157_v57 = vpack.c.bf16 %v1141_v0, %v1139_v1  ;;  %v1140_v59 = vld [vmem:[%s3571_s17 + $0xd0] sm:$0xff]  ;;  %v1360_v54 = vld [vmem:[#allocation20 + $0x58] sm:$0xff] }
 0x73c   : > { %v1158_v12 = vmul.f32 %v3299_v60, %v3266_v17  ;;  %v2159_v8 = vpack.c.bf16 %v1140_v59, %v1138_v58  ;;  %v1357_v0 = vld [vmem:[#allocation20 + $0x40] sm:$0xff]  ;;  %v1364_v58 = vld [vmem:[#allocation20 + $0x78] sm:$0xff] }
 0x73d   : > { %v1159_v53 = vmul.f32 %v3307_v63, %v3264_v14 }
 0x73f   : > { %1865 = vmatprep.mubr.msk.f32.mxu1 %vm436_vm2, %v1159_v53  ;;  %v1142_v53 = vld [vmem:[%s3571_s17 + $0xe0] sm:$0xff] }
 0x740   : > { %1272 = vmatmul.mubr.f32.vlgmr.msra.gmra.mrb[2].mxu1 %v1158_v12  ;;  %v1147_v12 = vld [vmem:[%s3571_s17 + $0x108] sm:$0xff] }
 0x741   : > { %2136 = vmatpush1.bf16.msra.mxu1 %v2135_v10  ;;  %1866 = vmatprep.mubr.msk.f32.mxu1 %vm436_vm2, %v3264_v14  ;;  %v1129_v14 = vld [vmem:[%s3571_s17 + $0x78] sm:$0xff]  ;;  %v1144_v10 = vld [vmem:[%s3571_s17 + $0xf0] sm:$0xff] }
 0x742   : > { %2138 = vmatprep.subr.bf16.mxu1 %v2137_v13  ;;  %v2145_v32 = vpack.c.bf16 %v1129_v14, %v1127_v26  ;;  %v1149_v13 = vld [vmem:[%s3571_s17 + $0x118] sm:$0xff]  ;;  %v2163_v16 = vpack.c.bf16 %v1144_v10, %v1142_v53  ;;  %v1150_v26 = vld [vmem:[%s3571_s17 + $0x120] sm:$0xff]  ;;  %v1152_v14 = vld [vmem:[%s3571_s17 + $0x130] sm:$0xff] }
 0x743   : > { %v2165_v18 = vpack.c.bf16 %v1149_v13, %v1147_v12  ;;  %v1368_v53 = vld [vmem:[#allocation20 + $0x98] sm:$0xff]  ;;  %v1367_v12 = vld [vmem:[#allocation20 + $0x90] sm:$0xff]  ;;  %v1370_v13 = vld [vmem:[#allocation20 + $0xa8] sm:$0xff] }
 0x745   : > { %2140 = vmatpush1.bf16.msra.mxu1 %v2139_v22  ;;  %v1151_v22 = vld [vmem:[%s3571_s17 + $0x128] sm:$0xff] }
 0x746   : > { %2142 = vmatprep.subr.bf16.mxu1 %v2141_v23  ;;  %v1153_v23 = vld [vmem:[%s3571_s17 + $0x138] sm:$0xff] }
 0x747   : > { %v2169_v25 = vpack.c.bf16 %v1153_v23, %v1151_v22  ;;  %v1371_v22 = vld [vmem:[#allocation20 + $0xb0] sm:$0xff]  ;;  %v1374_v23 = vld [vmem:[#allocation20 + $0xc8] sm:$0xff] }
 0x749   : > { %2144 = vmatpush1.bf16.msra.mxu1 %v2143_v29  ;;  %v1155_v29 = vld [vmem:[%s3571_s17 + $0x148] sm:$0xff] }
 0x74a   : > { %2146 = vmatprep.subr.bf16.mxu1 %v2145_v32  ;;  %v2173_v31 = vpack.c.bf16 %v1157_v30, %v1155_v29  ;;  %v1154_v32 = vld [vmem:[%s3571_s17 + $0x140] sm:$0xff]  ;;  %v1378_v30 = vld [vmem:[#allocation20 + $0xe8] sm:$0xff] }
 0x74b   : > { %v2175_v37 = vpack.c.bf16 %v1156_v34, %v1154_v32  ;;  %v1375_v29 = vld [vmem:[#allocation20 + $0xd0] sm:$0xff]  ;;  %v1377_v34 = vld [vmem:[#allocation20 + $0xe0] sm:$0xff] }
 0x74d   : > { %2148 = vmatpush1.bf16.msra.mxu1 %v2147_v43  ;;  %v1351_v43 = vld [vmem:[#allocation20 + $0x10] sm:$0xff] }
 0x74e   : > { %2150 = vmatprep.subr.bf16.mxu1 %v2149_v45  ;;  %v1354_v45 = vld [vmem:[#allocation20 + $0x28] sm:$0xff]  ;;  %v2179_v47 = vpack.c.bf16 %v1351_v43, %v1349_v40  ;;  %v1381_v43 = vld [vmem:[#allocation20 + $0x100] sm:$0xff] }
 0x74f   : > { %v2181_v49 = vpack.c.bf16 %v1356_v46, %v1354_v45  ;;  %v1383_v45 = vld [vmem:[#allocation20 + $0x110] sm:$0xff]  ;;  %v1386_v46 = vld [vmem:[#allocation20 + $0x128] sm:$0xff] }
 0x751   : > { %2152 = vmatpush1.bf16.msra.mxu1 %v2151_v51  ;;  %v1355_v51 = vld [vmem:[#allocation20 + $0x30] sm:$0xff] }
 0x752   : > { %2154 = vmatprep.subr.bf16.mxu1 %v2153_v52  ;;  %v1358_v52 = vld [vmem:[#allocation20 + $0x48] sm:$0xff]  ;;  %v2183_v55 = vpack.c.bf16 %v1355_v51, %v1353_v50  ;;  %v1385_v51 = vld [vmem:[#allocation20 + $0x120] sm:$0xff] }
 0x753   : > { %v2185_v1 = vpack.c.bf16 %v1360_v54, %v1358_v52  ;;  %v1387_v52 = vld [vmem:[#allocation20 + $0x130] sm:$0xff]  ;;  %v1390_v54 = vld [vmem:[#allocation20 + $0x148] sm:$0xff] }
 0x755   : > { %2156 = vmatpush1.bf16.msra.mxu1 %v2155_v56  ;;  %v1359_v56 = vld [vmem:[#allocation20 + $0x50] sm:$0xff] }
 0x756   : > { %2158 = vmatprep.subr.bf16.mxu1 %v2157_v57  ;;  %v1362_v57 = vld [vmem:[#allocation20 + $0x68] sm:$0xff]  ;;  %v2187_v59 = vpack.c.bf16 %v1359_v56, %v1357_v0  ;;  %v1389_v56 = vld [vmem:[#allocation20 + $0x140] sm:$0xff] }
 0x757   : > { %v2189_v61 = vpack.c.bf16 %v1364_v58, %v1362_v57  ;;  %v1391_v57 = vld [vmem:[#allocation20 + $0x150] sm:$0xff] }
 0x758   : > { %v2219_v58 = vpack.c.bf16 %v1391_v57, %v1389_v56  ;;  %v1555_v56 = vrot.slane %v3121_v33, 4 }
 0x759   : > { %2160 = vmatpush1.bf16.msra.mxu1 %v2159_v8  ;;  %v1363_v8 = vld [vmem:[#allocation20 + $0x70] sm:$0xff] }
 0x75a   : > { %2162 = vmatprep.subr.bf16.mxu1 %v2161_v9  ;;  %v1366_v9 = vld [vmem:[#allocation20 + $0x88] sm:$0xff]  ;;  %v1556_v57 = vmax.f32 %v3121_v33, %v1555_v56 }
 0x75b   : > { %v2193_v10 = vpack.c.bf16 %v1368_v53, %v1366_v9 }
 0x75d   : > { %2164 = vmatpush1.bf16.msra.mxu1 %v2163_v16  ;;  %2331 = vset.pattern.permute.xlu0 %v2757_v11  ;;  %v2171_v11 = vpack.c.bf16 %v1152_v14, %v1150_v26  ;;  %v1372_v16 = vld [vmem:[#allocation20 + $0xb8] sm:$0xff]  ;;  %v1373_v14 = vld [vmem:[#allocation20 + $0xc0] sm:$0xff] }
 0x75e   : > { %2166 = vmatprep.subr.bf16.mxu1 %v2165_v18  ;;  %v2197_v19 = vpack.c.bf16 %v1372_v16, %v1370_v13 }
 0x761   : > { %2168 = vmatpush1.bf16.msra.mxu1 %v2167_v24  ;;  %v1376_v24 = vld [vmem:[#allocation20 + $0xd8] sm:$0xff] }
 0x762   : > { %2170 = vmatprep.subr.bf16.mxu1 %v2169_v25  ;;  %v2199_v25 = vpack.c.bf16 %v1371_v22, %v1369_v21  ;;  %v2201_v26 = vpack.c.bf16 %v1376_v24, %v1374_v23 }
 0x765   : > { %2172 = vmatpush1.bf16.msra.mxu1 %v2171_v11  ;;  %v1380_v11 = vld [vmem:[#allocation20 + $0xf8] sm:$0xff] }
 0x766   : > { %2174 = vmatprep.subr.bf16.mxu1 %v2173_v31  ;;  %v2203_v31 = vpack.c.bf16 %v1375_v29, %v1373_v14  ;;  %v2205_v32 = vpack.c.bf16 %v1380_v11, %v1378_v30 }
 0x769   : > { %2176 = vmatpush1.bf16.msra.mxu1 %v2175_v37  ;;  %v1384_v37 = vld [vmem:[#allocation20 + $0x118] sm:$0xff] }
 0x76a   : > { %2178 = vmatprep.subr.bf16.mxu1 %v2177_v39  ;;  %v2207_v39 = vpack.c.bf16 %v1379_v35, %v1377_v34  ;;  %v2209_v40 = vpack.c.bf16 %v1384_v37, %v1382_v36 }
 0x76c   : > { %1343 = vmatmul.mubr.f32.vlgmr.msra.gmra.mrb[2].mxu1 %v3266_v17  ;;  %v2191_v17 = vpack.c.bf16 %v1363_v8, %v1361_v62  ;;  %v1863_v8 = vmul.f32 -1.442695, %v3286_v48 }
 0x76d   : > { %2180 = vmatpush1.bf16.msra.mxu1 %v2179_v47  ;;  %1867 = vmatprep.mubr.msk.f32.mxu1 %vm436_vm2, %v3307_v63  ;;  %v1365_v63 = vld [vmem:[#allocation20 + $0x80] sm:$0xff]  ;;  %v1388_v47 = vld [vmem:[#allocation20 + $0x138] sm:$0xff] }
 0x76e   : > { %2182 = vmatprep.subr.bf16.mxu1 %v2181_v49  ;;  %v2195_v18 = vpack.c.bf16 %v1367_v12, %v1365_v63  ;;  %v2211_v49 = vpack.c.bf16 %v1383_v45, %v1381_v43  ;;  %v2213_v50 = vpack.c.bf16 %v1388_v47, %v1386_v46  ;;  %2340 = vpow2.f32 %v1863_v8 }
 0x771   : > { %2184 = vmatpush1.bf16.msra.mxu1 %v2183_v55  ;;  %v1392_v55 = vld [vmem:[#allocation20 + $0x158] sm:$0xff] }
 0x772   : > { %2186 = vmatprep.subr.bf16.mxu1 %v2185_v1  ;;  %v2215_v1 = vpack.c.bf16 %v1387_v52, %v1385_v51  ;;  %v2217_v0 = vpack.c.bf16 %v1392_v55, %v1390_v54 }
 0x775   : > { %2188 = vmatpush1.bf16.msra.mxu1 %v2187_v59 }
 0x776   : > { %2190 = vmatprep.subr.bf16.mxu1 %v2189_v61 }
 0x778   : > { %v2341_v9 = vpop.eup %2340 }
 0x779   : > { %2192 = vmatpush1.bf16.msra.mxu1 %v2191_v17  ;;  %v1000_v53 = vadd.f32 1.0, %v2341_v9 }
 0x77a   : > { %2194 = vmatprep.subr.bf16.mxu1 %v2193_v10 }
 0x77b   : > { %2342 = vrcp.f32 %v1000_v53 }
 0x77d   : > { %2196 = vmatpush1.bf16.msra.mxu1 %v2195_v18 }
 0x77e   : > { %2198 = vmatprep.subr.bf16.mxu1 %v2197_v19 }
 0x781   : > { %2200 = vmatpush1.bf16.msra.mxu1 %v2199_v25 }
 0x782   : > { %2202 = vmatprep.subr.bf16.mxu1 %v2201_v26 }
 0x785   : > { %2204 = vmatpush1.bf16.msra.mxu1 %v2203_v31  ;;  %v2343_v12 = vpop.eup %2342 }
 0x786   : > { %2206 = vmatprep.subr.bf16.mxu1 %v2205_v32  ;;  %v1533_v16 = vsub.f32 %v3273_v20, %v2343_v12 }
 0x788   : > { %v1534_v23 = vmul.f32 %v1533_v16, %v1533_v16 }
 0x789   : > { %2208 = vmatpush1.bf16.msra.mxu1 %v2207_v39  ;;  %v1876_v39 = vld [vmem:[%s3612_s27] ss:$0 sm:$0xff] }
 0x78a   : > { %2210 = vmatprep.subr.bf16.mxu1 %v2209_v40 }
 0x78d   : > { %2212 = vmatpush1.bf16.msra.mxu1 %v2211_v49 }
 0x78e   : > { %2214 = vmatprep.subr.bf16.mxu1 %v2213_v50 }
 0x791   : > { %2216 = vmatpush1.bf16.msra.mxu1 %v2215_v1 }
 0x792   : > { %2218 = vmatprep.subr.bf16.mxu1 %v2217_v0 }
 0x795   : > { %2220 = vmatpush1.bf16.msra.mxu1 %v2219_v58  ;;  %v1557_v58 = vrot.slane %v1556_v57, 2 }
 0x798   : > { %1461 = vmatmul.mubr.f32.vlgmr.msra.gmra.mrb[2].mxu1 %v3299_v60  ;;  %v1469_v60 = vld [vmem:[%s3574_s20] sm:$0x3] }
 0x799   : > { %v1474_v17 = vrot.slane %v1469_v60, %v3156_v44  ;;  %v1478_v10 = vrot.slane %v1469_v60, %v3150_v42  ;;  %v1530_v60 = vld [vmem:[%s1529_s28] sm:$0xff] }
 0x7b4   : > { %v1598_v59 = vpop.trf.xlu0 }
 0x7b5   : > { %1901 = vmatmul.mubr.msk.f32.vlgmr.msra.gmra.mrb[14].mxu0 %vm1614_vm6, %v1598_v59  ;;  %v1502_v59 = vpop.xlane.xlu1 %1501 }
 0x7b6   : > { %1903 = vmatprep.mubr.msk.f32.mxu0 %vm2754_vm3, %v2752_v15  ;;  %vm1505_vm9 = vcmp.eq.f32.partialorder %v1502_v59, inf  ;;  %vm1507_vm10 = vcmp.eq.f32.partialorder %v1502_v59, 0.0 }
 0x7b8   : > { %v1599_v61 = vpop.trf.xlu0 }
 0x7b9   : > { %1904 = vmatmul.mubr.msk.f32.gmra.mrb[16].mxu0 %vm1614_vm6, %v1599_v61  ;;  %v1558_v61 = vmax.f32 %v1556_v57, %v1557_v58 }
 0x7ba   : > { %1906 = vmatprep.mubr.msk.f32.mxu0 %vm2754_vm3, %v2752_v15 }
 0x7bc   : > { %v1600_v62 = vpop.trf.xlu0 }
 0x7bd   : > { %1907 = vmatmul.mubr.msk.f32.gmra.mrb[18].mxu0 %vm1614_vm6, %v1600_v62  ;;  %v1559_v62 = vrot.slane %v1558_v61, 1 }
 0x7bf   : > { %v1560_v53 = vmax.f32 %v1558_v61, %v1559_v62 }
 0x86b   : > { %v1462_v63 = vpop.f32.mrb[2].mxu1 }
 0x86c   : > { %v3465_v0 = vadd.f32 %v1474_v17, %v1462_v63   ;;  %v1464_v15 = vpop.f32.mrb[3].mxu1  ;;  %v1561_v17 = vld [vmem:[%s3614_s30] sm:$0x1] }
 0x86d   : > { %v3467_v1 = vadd.f32 %v1478_v10, %v1464_v15   ;;  %v1562_v12 = vmul.f32 %v1561_v17, %v1560_v53 }
 0x86e   : > { %v1491_v44 = vmul.f32 %v3351_v27, %v3465_v0  ;;  %v1510_v42 = vmul.f32 %v3465_v0, %v3465_v0 }
 0x86f   : > { %v1492_v48 = vmul.f32 %v3353_v28, %v3467_v1  ;;  %v1511_v13 = vmul.f32 %v3467_v1, %v3467_v1  ;;  %v1535_v28 = vsel %vm1011_vm5, %v1534_v23, 0.0 }
 0x871   : > { %v1493_v18 = vsel %vm436_vm2, %v1492_v48, 0.0  ;;  %v1512_v19 = vsel %vm436_vm2, %v1511_v13, 0.0  ;;  %v1564_v13 = vsel %vm1563_vm8, %v1562_v12, 0.0 }
 0x872   : > { %v1494_v21 = vadd.f32 %v1493_v18, %v1491_v44  ;;  %v1513_v22 = vadd.f32 %v1512_v19, %v1510_v42  ;;  %v1508_v44 = vand.u32 2147483648, %v1502_v59 }
 0x874   : > { %1495 = vadd.xlane.f32.xlu1 %v1494_v21  ;;  %1514 = vadd.xlane.f32.xlu0 %v1513_v22 }
 0x878   : > { %1536 = vadd.xlane.f32.xlu1 %v1535_v28 }
 0x888   : > { %v1690_v24 = vpop.f32.mrb[14].mxu0 }
 0x889   : > { %v1873_v20 = vmul.f32 -1.442695, %v1690_v24  ;;  %v1902_v25 = vpop.f32.mrb[15].mxu0 }
 0x88b   : > { %2344 = vpow2.f32 %v1873_v20 }
 0x88c   : > { %v1695_v27 = vpop.f32.mrb[16].mxu0 }
 0x88d   : > { %v1874_v26 = vmul.f32 -1.442695, %v1695_v27  ;;  %v1905_v14 = vpop.f32.mrb[17].mxu0 }
 0x88f   : > { %2346 = vpow2.f32 %v1874_v26  ;;  %v1532_v26 = vld [vmem:[%s1531_s5] sm:$0xff] }
 0x890   : > { %v1700_v29 = vpop.f32.mrb[18].mxu0 }
 0x891   : > { %v1875_v30 = vmul.f32 -1.442695, %v1700_v29  ;;  %v1908_v11 = vpop.f32.mrb[19].mxu0 }
 0x893   : > { %2348 = vpow2.f32 %v1875_v30 }
 0x895   : > { %v2345_v31 = vpop.eup %2344 }
 0x896   : > { %v1713_v32 = vadd.f32 1.0, %v2345_v31 }
 0x898   : > { %2350 = vrcp.f32 %v1713_v32 }
 0x899   : > { %v2347_v34 = vpop.eup %2346 }
 0x89a   : > { %v1714_v35 = vadd.f32 1.0, %v2347_v34 }
 0x89c   : > { %2352 = vrcp.f32 %v1714_v35 }
 0x89d   : > { %v2349_v36 = vpop.eup %2348 }
 0x89e   : > { %v1715_v37 = vadd.f32 1.0, %v2349_v36 }
 0x8a0   : > { %2354 = vrcp.f32 %v1715_v37 }
 0x8a1   : > { %2356 = vrsqrt.f32 %v1502_v59 }
 0x8a2   : > { %v2351_v40 = vpop.eup %2350 }
 0x8a3   : > { %v1729_v43 = vmul.f32 %v2351_v40, %v1876_v39 }
 0x8a5   : > { %v1732_v47 = vsel %vm1011_vm5, %v1729_v43, 0.0 }
 0x8a6   : > { %v2353_v45 = vpop.eup %2352 }
 0x8a7   : > { %v1730_v46 = vmul.f32 %v2353_v45, %v1876_v39 }
 0x8a9   : > { %v1733_v49 = vsel %vm1011_vm5, %v1730_v46, 0.0 }
 0x8aa   : > { %v2355_v50 = vpop.eup %2354  ;;  %v1734_v51 = vadd.f32 %v1733_v49, %v1732_v47 }
 0x8ab   : > { %v1731_v52 = vmul.f32 %v2355_v50, %v1876_v39  ;;  %v2357_v33 = vpop.eup %2356 }
 0x8ac   : > { %v1504_v48 = vmul.f32 %v2357_v33, %v1502_v59 }
 0x8ad   : > { %v1735_v54 = vsel %vm1011_vm5, %v1731_v52, 0.0 }
 0x8ae   : > { %v1736_v55 = vadd.f32 %v1735_v54, %v1734_v51  ;;  %v1506_v42 = vsel %vm1505_vm9, %v1502_v59, %v1504_v48 }
 0x8af   : > { %v1509_v22 = vsel %vm1507_vm10, %v1508_v44, %v1506_v42 }
 0x901   : > { %v1515_v8 = vpop.xlane.xlu0 %1514  ;;  %v1496_v9 = vpop.xlane.xlu1 %1495 }
 0x902   : > { %2358 = vrsqrt.f32 %v1515_v8  ;;  %vm1518_vm11 = vcmp.eq.f32.partialorder %v1515_v8, inf  ;;  %v1521_v19 = vand.u32 2147483648, %v1515_v8  ;;  %vm1520_vm12 = vcmp.eq.f32.partialorder %v1515_v8, 0.0 }
 0x905   : > { %v1537_v10 = vpop.xlane.xlu1 %1536 }
 0x906   : > { %v1538_v63 = vmul.f32 %v1537_v10, %v1530_v60 }
 0x908   : > { %v1540_v15 = vsel %vm1539_vm7, %v1538_v63, 0.0 }
 0x909   : > { %1541 = vadd.xlane.f32.xlu1 %v1540_v15 }
 0x90c   : > { %v2359_v16 = vpop.eup %2358 }
 0x90d   : > { %v1517_v18 = vmul.f32 %v2359_v16, %v1515_v8  ;;  %1565 = vadd.xlane.f32.xlu1 %v1564_v13  ;;  %v1767_v16 = vand.u32 (%p248_p13), 127, %v587_v38 }
 0x90f   : > { %v1519_v21 = vsel %vm1518_vm11, %v1515_v8, %v1517_v18  ;;  %vm1771_vm14 = vcmp.eq.s32.totalorder (%p248_p13), %v1767_v16, 0  ;;  %vm1774_vm15 = vcmp.eq.s32.totalorder (%p248_p13), %v1767_v16, 1  ;;  %vm1778_vm0 = vcmp.eq.s32.totalorder (%p248_p13), %v1767_v16, 2 }
 0x910   : > { %v1522_v23 = vsel %vm1520_vm12, %v1521_v19, %v1519_v21  ;;  %vm1772_vm1 = vmand (%p248_p13), %vm1770_vm13, %vm1771_vm14  ;;  %vm1782_vm2 = vcmp.eq.s32.totalorder (%p248_p13), %v1767_v16, 3  ;;  %vm1786_vm4 = vcmp.eq.s32.totalorder (%p248_p13), %v1767_v16, 4 }
 0x911   : > { %v1523_v28 = vmul.f32 %v1522_v23, %v1509_v22  ;;  %1737 = vadd.xlane.f32.xlu1 %v1736_v55  ;;  %vm1775_vm3 = vmand (%p248_p13), %vm1770_vm13, %vm1774_vm15 }
 0x912   :  { %vm1779_vm5 = vmand (%p248_p13), %vm1770_vm13, %vm1778_vm0 }
 0x913   : > { %v1524_v24 = vmax.f32 %v1523_v28, 1e-08  ;;  %vm1783_vm6 = vmand (%p248_p13), %vm1770_vm13, %vm1782_vm2 }
 0x915   : > { %2360 = vrcp.f32 %v1524_v24 }
 0x91f   : > { %v2361_v20 = vpop.eup %2360 }
 0x920   : > { %v1526_v25 = vmul.f32 %v2361_v20, %v1496_v9 }
 0x922   : > { %v1748_v27 = vmul.f32 0.5, %v1526_v25 }
 0x924   : > { %v1749_v14 = vadd.f32 0.5, %v1748_v27 }
 0x926   : > { %v1750_v29 = vmul.f32 %v1749_v14, %v1532_v26 }
 0x928   : > { %v1751_v30 = vsel %vm1539_vm7, %v1750_v29, 0.0  ;;  %vm1787_vm7 = vmand (%p248_p13), %vm1770_vm13, %vm1786_vm4 }
 0x929   : > { %1752 = vadd.xlane.f32.xlu1 %v1751_v30 }
 0x996   : > { %v1542_v11 = vpop.xlane.xlu1 %1541 }
 0x997   : > { %v1543_v31 = vrot.slane %v1542_v11, 4 }
 0x999   : > { %v1544_v32 = vadd.f32 %v1543_v31, %v1542_v11 }
 0x99a   : > { %v1566_v34 = vpop.xlane.xlu1 %1565 }
 0x99b   : > { %v1545_v35 = vrot.slane %v1544_v32, 2  ;;  %v1567_v36 = vrot.slane %v1566_v34, 4 }
 0x99d   : > { %v1546_v37 = vadd.f32 %v1545_v35, %v1544_v32  ;;  %v1568_v39 = vadd.f32 %v1567_v36, %v1566_v34 }
 0x99e   : > { %v1738_v40 = vpop.xlane.xlu1 %1737 }
 0x99f   : > { %v1547_v43 = vrot.slane %v1546_v37, 1  ;;  %v1569_v45 = vrot.slane %v1568_v39, 2  ;;  %v1739_v46 = vrot.slane %v1738_v40, 4 }
 0x9a1   : > { %v1548_v47 = vadd.f32 %v1547_v43, %v1546_v37  ;;  %v1740_v49 = vadd.f32 %v1739_v46, %v1738_v40  ;;  %v1570_v50 = vadd.f32 %v1569_v45, %v1568_v39 }
 0x9a3   : > { %2227 = vpush %v1548_v47  ;;  %v1741_v51 = vrot.slane %v1740_v49, 2  ;;  %v1571_v52 = vrot.slane %v1570_v50, 1 }
 0x9a5   : > { %v1572_v54 = vadd.f32 %v1571_v52, %v1570_v50  ;;  %v1742_v55 = vadd.f32 %v1741_v51, %v1740_v49 }
 0x9a7   : > { %2229 = vpush %v1572_v54  ;;  %v1743_v56 = vrot.slane %v1742_v55, 1 }
 0x9a9   : > { %v1744_v57 = vadd.f32 %v1743_v56, %v1742_v55 }
 0x9ab   : > { %2231 = vpush %v1744_v57 }
 0x9b6   : > { %v1753_v58 = vpop.xlane.xlu1 %1752 }
 0x9b7   : > { %v1754_v59 = vrot.slane %v1753_v58, 4 }
 0x9b9   : > { %v1755_v61 = vadd.f32 %v1754_v59, %v1753_v58 }
 0x9bb   : > { %v1756_v62 = vrot.slane %v1755_v61, 2 }
 0x9bd   : > { %v1757_v8 = vadd.f32 %v1756_v62, %v1755_v61 }
 0x9bf   : > { %v1758_v9 = vrot.slane %v1757_v8, 1 }
 0x9c1   : > { %v1759_v53 = vadd.f32 %v1758_v9, %v1757_v8 }
 0x9c3   : > { %2233 = vpush %v1759_v53 }
 0x9d4   : > { %s2228_s7 = spop %2227 }
 0x9d5   : > { %v1550_v60 = vstv %s2228_s7 }
 0x9d6   : > { %v1551_v17 = vadd.f32 %v2706_v3, %v1550_v60  }
 0x9d8   : > { %s2230_s15 = spop %2229  ;;  %v3617_v3 = vmov %v1551_v17 }
 0x9d9   : > { %v1574_v10 = vstv %s2230_s15 }
 0x9da   : > { %v1575_v33 = vadd.f32 %v2710_v4, %v1574_v10  }
 0x9dc   : > { %s2232_s25 = spop %2231  ;;  %v3618_v4 = vmov %v1575_v33  ;;  %v1780_v3 = vsel (%p248_p13), %vm1779_vm5, %v1575_v33, 0.0 }
 0x9dd   : > { %v1746_v63 = vstv %s2232_s25 }
 0x9de   : > { %v1747_v12 = vadd.f32 %v2702_v2, %v1746_v63  }
 0x9e0   : > { %v3616_v2 = vmov %v1747_v12  ;;  %v1788_v38 = vsel (%p248_p13), %vm1787_vm7, %v1747_v12, 0.0 }
 0x9f2   :  { %250 = sbr.rel (!%p248_p13) target bundleno = 265 (0x109), region = 181 }
 0x9f4   : > { %s2234_s1 = spop %2233 }
 0x9f5   : > { %v1761_v15 = vstv %s2234_s1 }
 0x9f6   : > { %v1762_v48 = vadd.f32 %v2714_v5, %v1761_v15  }
 0x9f8   : > { %v3619_v5 = vmov %v1762_v48  ;;  %v1763_v13 = vadd.f32 (%p248_p13), %v1762_v48, %v1575_v33  ;;  %v1776_v7 = vsel (%p248_p13), %vm1775_vm3, %v1762_v48, 0.0 }
 0x9f9   :  { %v1784_v5 = vsel %vm1783_vm6, %v1551_v17, 0.0 }
 0x9fa   :  { %v1764_v44 = vadd.f32 %v1763_v13, %v1551_v17 }
 0x9fc   :  { %v1765_v42 = vadd.f32 %v1764_v44, %v1747_v12 }
 0x9fe   :  { %v1773_v2 = vsel %vm1772_vm1, %v1765_v42, 0.0 }
 0x9ff   :  { %v1777_v4 = vadd.f32 %v1776_v7, %v1773_v2 }
 0xa01   :  { %v1781_v6 = vadd.f32 %v1780_v3, %v1777_v4 }
 0xa03   :  { %v1785_v1 = vadd.f32 %v1784_v5, %v1781_v6 }
 0xa05   :  { %v1789_v0 = vadd.f32 %v1788_v38, %v1785_v1 }
 0xa07   :  { %1790 = vst [vmem:[#allocation22] sm:$0xff] %v1789_v0 }
 0xa08   :  { %2637 = shalt.err (!%p2634_p4)
}
 0xa09   :  { %s3620_s21 = sld [smem:[#allocation43_spill]] }
 0xa0f   :  { %s2638_s22 = scalar_lea.hbm %s3620_s21, 128 }
 0xa10   :  { %p2639_p5 = scmp.ne.s32.totalorder %s3620_s21, %s2638_s22  ;;  %p2642_p6 = scmp.lt.u32.totalorder %s2638_s22, %s3620_s21 }
 0xa12   :  { %p2644_p7 = pnand %p2642_p6, %p2639_p5 }
 0xa14   :  { %2647 = shalt.err (!%p2644_p7)
}
 0xa15   :  { %1800 = dma.vmem_to_hbm [thread:$0]  %s1798_s14, 128, %s3620_s21, [#allocation4]  }
 0xa16   :  { %2698 = dma.done.wait [#allocation4], 128  }
 0xa17   :  { %2699 = vsyncadd [#allocation4], 4294967168 }
 0xa18   :  { %1804 = vsyncpa [#allocation3], 1 }
 0xa19   :  { %1805 = vsyncpa [#allocation6], 1 }
 0xa1a   :  { %1806 = vsyncpa [#allocation9], 1 }
 0xa1b   :  { %1807 = vsyncpa [#allocation12], 1 }
 0xa1c   :  { %1808 = vsyncpa [#allocation15], 1 }
 0xa1d   :  { %1809 = vsyncpa [#allocation18], 1 }
 0xa1e   :  { %1810 = vsyncpa [#allocation21], 1 }
 0xa1f   :  { %1811 = vsyncpa [#allocation4], 1 }

</bundles_post_ra>
